<compile_context>
chip_gen: v5e
topology: v5e:2x2
jax: 0.10.0
libtpu: 0.0.40
codegen_flags: <defaults>
</compile_context>

<pallas_src>
import functools

import jax
import jax.numpy as jnp
from jax.experimental import pallas as pl
from jax.experimental.pallas import tpu as pltpu


# ----------------------------- kernel helpers -----------------------------

def _layer_norm(x, gamma, beta, eps=1e-5):
    # torch.nn.LayerNorm over the last dim, biased variance, eps=1e-5
    mean = jnp.mean(x, axis=-1, keepdims=True)
    var = jnp.mean((x - mean) ** 2, axis=-1, keepdims=True)
    return (x - mean) * jax.lax.rsqrt(var + eps) * gamma + beta


def _gelu_exact(x):
    # torch.nn.GELU() default = exact erf-based GELU
    return 0.5 * x * (1.0 + jax.lax.erf(x * 0.7071067811865476))


# ----------------------------- Pallas kernel ------------------------------

def fused_decoder_kernel(x_ref,
                         ln1g_ref, ln1b_ref, wqkv_ref, wo_ref, bo_ref,
                         ln2g_ref, ln2b_ref, w1_ref, b1_ref, w2_ref, b2_ref,
                         o_ref, *, num_layers, B, N, D, num_heads, dim_head):
    scale = dim_head ** (-0.5)
    hd = num_heads * dim_head

    # In-kernel causal additive mask (module's compute_mask: triu(ones) - eye).
    # 0 where attended, -1e30 where masked (finite -> no NaN risk). Stays f32.
    row = jax.lax.broadcasted_iota(jnp.int32, (N, N), 0)
    col = jax.lax.broadcasted_iota(jnp.int32, (N, N), 1)
    add_mask = jnp.where(col > row, -1e30, 0.0).astype(jnp.float32)

    x = x_ref[...]                                   # (B*N, D) f32, resident in VMEM

    # Static layer unroll: all layers' weights already live in VMEM.
    for l in range(num_layers):
        # ---------------- masked self-attention sub-block ----------------
        h = _layer_norm(x, ln1g_ref[l], ln1b_ref[l])          # f32 (BN, D)
        # One fused, lane-dense QKV matmul on the MXU (bf16 operands, f32 acc).
        qkv = jnp.dot(h.astype(jnp.bfloat16), wqkv_ref[l],
                      preferred_element_type=jnp.float32)      # (BN, 3*hd) f32

        att = jnp.zeros((B * N, D), jnp.float32)
        for hh in range(num_heads):                            # tiny H: static unroll
            q = qkv[:, 0 * hd + hh * dim_head: 0 * hd + (hh + 1) * dim_head]
            k = qkv[:, 1 * hd + hh * dim_head: 1 * hd + (hh + 1) * dim_head]
            v = qkv[:, 2 * hd + hh * dim_head: 2 * hd + (hh + 1) * dim_head]
            q = q.reshape(B, N, dim_head).astype(jnp.bfloat16)
            k = k.reshape(B, N, dim_head).astype(jnp.bfloat16)
            v = v.reshape(B, N, dim_head).astype(jnp.bfloat16)

            # scores, mask add and softmax stay in f32
            s = jnp.einsum('bqd,bkd->bqk', q, k,
                           preferred_element_type=jnp.float32) * scale + add_mask
            m = jnp.max(s, axis=-1, keepdims=True)
            e = jnp.exp(s - m)
            p = e * pl.reciprocal(jnp.sum(e, axis=-1, keepdims=True), approx=True)

            oh = jnp.einsum('bqk,bkd->bqd', p.astype(jnp.bfloat16), v,
                            preferred_element_type=jnp.float32)       # (B, N, Dh)
            # Output projection accumulated per head:
            #   concat(heads) @ Wout == sum_h oh_h @ Wout_h   (no concatenate)
            att = att + jnp.dot(oh.reshape(B * N, dim_head).astype(jnp.bfloat16),
                                wo_ref[l, hh], preferred_element_type=jnp.float32)

        x = x + att + bo_ref[l]                                # residual (+ out bias once)

        # ---------------- feed-forward sub-block ----------------
        h2 = _layer_norm(x, ln2g_ref[l], ln2b_ref[l])
        f = jnp.dot(h2.astype(jnp.bfloat16), w1_ref[l],
                    preferred_element_type=jnp.float32) + b1_ref[l]
        f = _gelu_exact(f)
        f = jnp.dot(f.astype(jnp.bfloat16), w2_ref[l],
                    preferred_element_type=jnp.float32) + b2_ref[l]
        x = x + f                                              # residual

    o_ref[...] = x                                             # single HBM writeback


# ----------------------------- wrapper -------------------------------------

def transformer_decoder(x, layer_params, *, num_heads, dim_head):
    """Whole decoder in one pallas_call / one grid step; x aliased to the output."""
    B, N, D = x.shape
    L = len(layer_params)
    mlp_dim = layer_params[0]["w1"].shape[-1]

    def stack(name, dtype):
        return jnp.stack([p[name] for p in layer_params]).astype(dtype)

    # MXU operands in bf16 (native MXU path, half the weight bytes); LN/bias in f32.
    wqkv = stack("w_qkv", jnp.bfloat16)                                   # (L, D, 3*H*Dh)
    wo = stack("w_out", jnp.bfloat16).reshape(L, num_heads, dim_head, D)  # head-major
    w1 = stack("w1", jnp.bfloat16)                                        # (L, D, mlp)
    w2 = stack("w2", jnp.bfloat16)                                        # (L, mlp, D)
    ln1g, ln1b = stack("ln1_g", jnp.float32), stack("ln1_b", jnp.float32)
    ln2g, ln2b = stack("ln2_g", jnp.float32), stack("ln2_b", jnp.float32)
    bo = stack("b_out", jnp.float32)                                      # (L, 1, D)
    b1 = stack("b1", jnp.float32)                                         # (L, 1, mlp)
    b2 = stack("b2", jnp.float32)                                         # (L, 1, D)

    # Activations flat (B*N, D): 16-sublane slab, no per-layer relayout in-kernel.
    x_flat = x.reshape(B * N, D).astype(jnp.float32)

    kern = functools.partial(fused_decoder_kernel, num_layers=L, B=B, N=N, D=D,
                             num_heads=num_heads, dim_head=dim_head)

    def full(a):
        return pl.BlockSpec(a.shape, lambda i, _nd=a.ndim: (0,) * _nd)

    grid_spec = pltpu.PrefetchScalarGridSpec(
        num_scalar_prefetch=0,
        grid=(1,),                      # single step: whole decoder in one invocation
        in_specs=[full(x_flat),
                  full(ln1g), full(ln1b), full(wqkv), full(wo), full(bo),
                  full(ln2g), full(ln2b), full(w1), full(b1), full(w2), full(b2)],
        out_specs=pl.BlockSpec((B * N, D), lambda i: (0, 0)),
    )

    out_flat = pl.pallas_call(
        kern,
        out_shape=jax.ShapeDtypeStruct((B * N, D), jnp.float32),
        grid_spec=grid_spec,
        input_output_aliases={0: 0},    # result reuses the activation HBM buffer
        compiler_params=pltpu.CompilerParams(dimension_semantics=("arbitrary",)),
    )(x_flat, ln1g, ln1b, wqkv, wo, bo, ln2g, ln2b, w1, b1, w2, b2)

    return out_flat.reshape(B, N, D)


# ----------------------------- pure-JAX reference ---------------------------

def reference_decoder(x, mask, layer_params, *, num_heads, dim_head):
    B, N, D = x.shape
    for p in layer_params:
        h = _layer_norm(x, p["ln1_g"], p["ln1_b"])
        qkv = h @ p["w_qkv"]
        q, k, v = jnp.split(qkv, 3, axis=-1)

        def heads(t):
            return t.reshape(B, N, num_heads, dim_head).transpose(0, 2, 1, 3)

        q, k, v = heads(q), heads(k), heads(v)
        scores = jnp.einsum("bhnd,bhmd->bhnm", q, k) * (dim_head ** -0.5)
        scores = jnp.where(mask == 1.0, -jnp.inf, scores)
        attn = jax.nn.softmax(scores, axis=-1)
        out = jnp.einsum("bhnm,bhmd->bhnd", attn, v)
        out = out.transpose(0, 2, 1, 3).reshape(B, N, num_heads * dim_head)
        x = x + (out @ p["w_out"] + p["b_out"])

        h2 = _layer_norm(x, p["ln2_g"], p["ln2_b"])
        f = jax.nn.gelu(h2 @ p["w1"] + p["b1"], approximate=False)
        x = x + (f @ p["w2"] + p["b2"])
    return x


# ----------------------------- main -----------------------------------------

if __name__ == "__main__":
    # TransformerDecoder(input_dim=32, num_layers=2, num_heads=2,
    #                    dim_head_output=64, mlp_dim=64, dropout=0.0)
    B, N, D = 2, 8, 32
    num_layers, num_heads, dim_head, mlp_dim = 2, 2, 64, 64
    hd = num_heads * dim_head

    key = jax.random.PRNGKey(0)
    keys = jax.random.split(key, 1 + num_layers)
    x = jax.random.normal(keys[0], (B, N, D), jnp.float32)

    # compute_mask: strictly-upper-triangular causal mask (triu(ones) - eye);
    # the Pallas kernel generates this same mask in-kernel.
    mask = jnp.triu(jnp.ones((N, N), jnp.float32)) - jnp.eye(N, dtype=jnp.float32)

    layer_params = []
    for li in range(num_layers):
        ks = jax.random.split(keys[1 + li], 7)
        layer_params.append(dict(
            ln1_g=jnp.ones((1, D), jnp.float32),
            ln1_b=jnp.zeros((1, D), jnp.float32),
            # nn.Linear weights pre-transposed to (in, out); qkv Linear has no bias.
            w_qkv=0.05 * jax.random.normal(ks[0], (D, 3 * hd), jnp.float32),
            w_out=0.05 * jax.random.normal(ks[1], (hd, D), jnp.float32),
            b_out=0.05 * jax.random.normal(ks[2], (1, D), jnp.float32),
            ln2_g=jnp.ones((1, D), jnp.float32),
            ln2_b=jnp.zeros((1, D), jnp.float32),
            w1=0.05 * jax.random.normal(ks[3], (D, mlp_dim), jnp.float32),
            b1=0.05 * jax.random.normal(ks[4], (1, mlp_dim), jnp.float32),
            w2=0.05 * jax.random.normal(ks[5], (mlp_dim, D), jnp.float32),
            b2=0.05 * jax.random.normal(ks[6], (1, D), jnp.float32),
        ))

    # TODO(synk): the PyTorch module also stashes per-layer attention weights in
    # self.attention_output during eval; that side buffer is not emitted here.

    # f32 reference computed first (kernel input buffer may be donated via aliasing).
    ref = reference_decoder(x, mask, layer_params,
                            num_heads=num_heads, dim_head=dim_head)

    out = transformer_decoder(x, layer_params,
                              num_heads=num_heads, dim_head=dim_head)
    out = jax.block_until_ready(out)

    assert out.shape == (B, N, D)
    # bf16 MXU operands (+ approx reciprocal in softmax) vs f32 reference:
    # compare at bf16-level tolerance.
    assert jnp.allclose(out, ref, atol=2e-2, rtol=2e-2), "Pallas output != reference"

    print("KERNEL_OK")
</pallas_src>

<mosaic_0001>
module attributes {stable_mosaic.version = 11 : i64} {
  func.func @fused_decoder_kernel(%arg0: i32, %arg1: memref<16x32xf32, #tpu.memory_space<vmem>>, %arg2: memref<2x1x32xf32, #tpu.memory_space<vmem>>, %arg3: memref<2x1x32xf32, #tpu.memory_space<vmem>>, %arg4: memref<2x32x384xbf16, #tpu.memory_space<vmem>>, %arg5: memref<2x2x64x32xbf16, #tpu.memory_space<vmem>>, %arg6: memref<2x1x32xf32, #tpu.memory_space<vmem>>, %arg7: memref<2x1x32xf32, #tpu.memory_space<vmem>>, %arg8: memref<2x1x32xf32, #tpu.memory_space<vmem>>, %arg9: memref<2x32x64xbf16, #tpu.memory_space<vmem>>, %arg10: memref<2x1x64xf32, #tpu.memory_space<vmem>>, %arg11: memref<2x64x32xbf16, #tpu.memory_space<vmem>>, %arg12: memref<2x1x32xf32, #tpu.memory_space<vmem>>, %arg13: memref<16x32xf32, #tpu.memory_space<vmem>>) attributes {dimension_semantics = [#tpu.dimension_semantics<arbitrary>], iteration_bounds = array<i64: 1>, scalar_prefetch = 0 : i64, scratch_operands = 0 : i64, tpu.core_type = #tpu.core_type<tc>, window_params = [{pipeline_mode = #tpu.pipeline_mode<synchronous>, transform_indices = @transform_0, window_bounds = array<i64: 16, 32>}, {pipeline_mode = #tpu.pipeline_mode<synchronous>, transform_indices = @transform_1, window_bounds = array<i64: 2, 1, 32>}, {pipeline_mode = #tpu.pipeline_mode<synchronous>, transform_indices = @transform_2, window_bounds = array<i64: 2, 1, 32>}, {pipeline_mode = #tpu.pipeline_mode<synchronous>, transform_indices = @transform_3, window_bounds = array<i64: 2, 32, 384>}, {pipeline_mode = #tpu.pipeline_mode<synchronous>, transform_indices = @transform_4, window_bounds = array<i64: 2, 2, 64, 32>}, {pipeline_mode = #tpu.pipeline_mode<synchronous>, transform_indices = @transform_5, window_bounds = array<i64: 2, 1, 32>}, {pipeline_mode = #tpu.pipeline_mode<synchronous>, transform_indices = @transform_6, window_bounds = array<i64: 2, 1, 32>}, {pipeline_mode = #tpu.pipeline_mode<synchronous>, transform_indices = @transform_7, window_bounds = array<i64: 2, 1, 32>}, {pipeline_mode = #tpu.pipeline_mode<synchronous>, transform_indices = @transform_8, window_bounds = array<i64: 2, 32, 64>}, {pipeline_mode = #tpu.pipeline_mode<synchronous>, transform_indices = @transform_9, window_bounds = array<i64: 2, 1, 64>}, {pipeline_mode = #tpu.pipeline_mode<synchronous>, transform_indices = @transform_10, window_bounds = array<i64: 2, 64, 32>}, {pipeline_mode = #tpu.pipeline_mode<synchronous>, transform_indices = @transform_11, window_bounds = array<i64: 2, 1, 32>}, {pipeline_mode = #tpu.pipeline_mode<synchronous>, transform_indices = @transform_12, window_bounds = array<i64: 16, 32>}]} {
    %0 = tpu.iota {dimensions = array<i32: 0>} : vector<8x8xi32>
    %1 = tpu.iota {dimensions = array<i32: 1>} : vector<8x8xi32>
    %2 = arith.cmpi sgt, %1, %0 : vector<8x8xi32>
    %cst = arith.constant -1.000000e+30 : f32
    %cst_0 = arith.constant 0.000000e+00 : f32
    %3 = vector.broadcast %cst : f32 to vector<8x8xf32>
    %4 = vector.broadcast %cst_0 : f32 to vector<8x8xf32>
    %5 = arith.select %2, %3, %4 : vector<8x8xi1>, vector<8x8xf32>
    %c0 = arith.constant 0 : index
    %c0_1 = arith.constant 0 : index
    %6 = vector.load %arg1[%c0, %c0_1] : memref<16x32xf32, #tpu.memory_space<vmem>>, vector<16x32xf32>
    %c0_2 = arith.constant 0 : index
    %c0_3 = arith.constant 0 : index
    %c0_4 = arith.constant 0 : index
    %7 = vector.load %arg2[%c0_2, %c0_3, %c0_4] : memref<2x1x32xf32, #tpu.memory_space<vmem>>, vector<1x1x32xf32>
    %8 = vector.shape_cast %7 : vector<1x1x32xf32> to vector<1x32xf32>
    %c0_5 = arith.constant 0 : index
    %c0_6 = arith.constant 0 : index
    %c0_7 = arith.constant 0 : index
    %9 = vector.load %arg3[%c0_5, %c0_6, %c0_7] : memref<2x1x32xf32, #tpu.memory_space<vmem>>, vector<1x1x32xf32>
    %10 = vector.shape_cast %9 : vector<1x1x32xf32> to vector<1x32xf32>
    %cst_8 = arith.constant dense<0.000000e+00> : vector<16xf32>
    %11 = vector.multi_reduction <add>, %6, %cst_8 [1] : vector<16x32xf32> to vector<16xf32>
    %12 = vector.shape_cast %11 : vector<16xf32> to vector<16x1xf32>
    %cst_9 = arith.constant 3.200000e+01 : f32
    %13 = vector.broadcast %cst_9 : f32 to vector<16x1xf32>
    %14 = arith.divf %12, %13 : vector<16x1xf32>
    %15 = vector.broadcast %14 : vector<16x1xf32> to vector<16x32xf32>
    %16 = arith.subf %6, %15 : vector<16x32xf32>
    %17 = arith.mulf %16, %16 : vector<16x32xf32>
    %cst_10 = arith.constant dense<0.000000e+00> : vector<16xf32>
    %18 = vector.multi_reduction <add>, %17, %cst_10 [1] : vector<16x32xf32> to vector<16xf32>
    %19 = vector.shape_cast %18 : vector<16xf32> to vector<16x1xf32>
    %cst_11 = arith.constant 3.200000e+01 : f32
    %20 = vector.broadcast %cst_11 : f32 to vector<16x1xf32>
    %21 = arith.divf %19, %20 : vector<16x1xf32>
    %22 = vector.broadcast %14 : vector<16x1xf32> to vector<16x32xf32>
    %23 = arith.subf %6, %22 : vector<16x32xf32>
    %cst_12 = arith.constant 9.99999974E-6 : f32
    %24 = vector.broadcast %cst_12 : f32 to vector<16x1xf32>
    %25 = arith.addf %21, %24 : vector<16x1xf32>
    %26 = math.rsqrt %25 : vector<16x1xf32>
    %27 = vector.broadcast %26 : vector<16x1xf32> to vector<16x32xf32>
    %28 = arith.mulf %23, %27 : vector<16x32xf32>
    %29 = vector.broadcast %8 : vector<1x32xf32> to vector<16x32xf32>
    %30 = arith.mulf %28, %29 : vector<16x32xf32>
    %31 = vector.broadcast %10 : vector<1x32xf32> to vector<16x32xf32>
    %32 = arith.addf %30, %31 : vector<16x32xf32>
    %33 = arith.truncf %32 : vector<16x32xf32> to vector<16x32xbf16>
    %c0_13 = arith.constant 0 : index
    %c0_14 = arith.constant 0 : index
    %c0_15 = arith.constant 0 : index
    %34 = vector.load %arg4[%c0_13, %c0_14, %c0_15] : memref<2x32x384xbf16, #tpu.memory_space<vmem>>, vector<1x32x384xbf16>
    %35 = vector.shape_cast %34 : vector<1x32x384xbf16> to vector<32x384xbf16>
    %cst_16 = arith.constant dense<0.000000e+00> : vector<16x384xf32>
    %36 = tpu.matmul %33, %35, %cst_16 {dimension_numbers = #tpu.dot_dimension_numbers<[1], [0], [0], [1], [0, 0, 1, 1], [], []>} : vector<16x32xbf16>, vector<32x384xbf16>, vector<16x384xf32> -> vector<16x384xf32>
    %cst_17 = arith.constant 0.000000e+00 : f32
    %37 = vector.broadcast %cst_17 : f32 to vector<16x32xf32>
    %38 = vector.extract_strided_slice %36 {offsets = [0, 0], sizes = [16, 64], strides = [1, 1]} : vector<16x384xf32> to vector<16x64xf32>
    %39 = vector.extract_strided_slice %36 {offsets = [0, 128], sizes = [16, 64], strides = [1, 1]} : vector<16x384xf32> to vector<16x64xf32>
    %40 = vector.extract_strided_slice %36 {offsets = [0, 256], sizes = [16, 64], strides = [1, 1]} : vector<16x384xf32> to vector<16x64xf32>
    %41 = vector.shape_cast %38 : vector<16x64xf32> to vector<2x8x64xf32>
    %42 = arith.truncf %41 : vector<2x8x64xf32> to vector<2x8x64xbf16>
    %43 = vector.shape_cast %39 : vector<16x64xf32> to vector<2x8x64xf32>
    %44 = arith.truncf %43 : vector<2x8x64xf32> to vector<2x8x64xbf16>
    %45 = vector.shape_cast %40 : vector<16x64xf32> to vector<2x8x64xf32>
    %46 = arith.truncf %45 : vector<2x8x64xf32> to vector<2x8x64xbf16>
    "tpu.trace_start"() <{level = 10 : i32, message = "bqd,bkd->bqk"}> : () -> ()
    %cst_18 = arith.constant dense<0.000000e+00> : vector<2x8x8xf32>
    %47 = tpu.matmul %42, %44, %cst_18 {dimension_numbers = #tpu.dot_dimension_numbers<[2], [2], [1], [1], [0, 0, 0, 1, 1, 1], [0], [0]>} : vector<2x8x64xbf16>, vector<2x8x64xbf16>, vector<2x8x8xf32> -> vector<2x8x8xf32>
    "tpu.trace_stop"() : () -> ()
    %cst_19 = arith.constant 1.250000e-01 : f32
    %48 = vector.broadcast %cst_19 : f32 to vector<2x8x8xf32>
    %49 = arith.mulf %47, %48 : vector<2x8x8xf32>
    %50 = vector.shape_cast %5 : vector<8x8xf32> to vector<1x8x8xf32>
    %51 = vector.broadcast %50 : vector<1x8x8xf32> to vector<2x8x8xf32>
    %52 = arith.addf %49, %51 : vector<2x8x8xf32>
    %cst_20 = arith.constant dense<0xFF800000> : vector<2x8xf32>
    %53 = vector.multi_reduction <maximumf>, %52, %cst_20 [2] : vector<2x8x8xf32> to vector<2x8xf32>
    %54 = vector.shape_cast %53 : vector<2x8xf32> to vector<2x8x1xf32>
    %55 = vector.broadcast %54 : vector<2x8x1xf32> to vector<2x8x8xf32>
    %56 = arith.subf %52, %55 : vector<2x8x8xf32>
    %57 = math.exp %56 : vector<2x8x8xf32>
    %cst_21 = arith.constant dense<0.000000e+00> : vector<2x8xf32>
    %58 = vector.multi_reduction <add>, %57, %cst_21 [2] : vector<2x8x8xf32> to vector<2x8xf32>
    %59 = vector.shape_cast %58 : vector<2x8xf32> to vector<2x8x1xf32>
    %60 = tpu.reciprocal %59 {approx = true} : vector<2x8x1xf32> -> vector<2x8x1xf32>
    %61 = vector.broadcast %60 : vector<2x8x1xf32> to vector<2x8x8xf32>
    %62 = arith.mulf %57, %61 : vector<2x8x8xf32>
    %63 = arith.truncf %62 : vector<2x8x8xf32> to vector<2x8x8xbf16>
    "tpu.trace_start"() <{level = 10 : i32, message = "bqk,bkd->bqd"}> : () -> ()
    %cst_22 = arith.constant dense<0.000000e+00> : vector<2x8x64xf32>
    %64 = tpu.matmul %63, %46, %cst_22 {dimension_numbers = #tpu.dot_dimension_numbers<[2], [1], [1], [2], [0, 0, 0, 1, 1, 2], [0], [0]>} : vector<2x8x8xbf16>, vector<2x8x64xbf16>, vector<2x8x64xf32> -> vector<2x8x64xf32>
    "tpu.trace_stop"() : () -> ()
    %65 = vector.shape_cast %64 : vector<2x8x64xf32> to vector<16x64xf32>
    %66 = arith.truncf %65 : vector<16x64xf32> to vector<16x64xbf16>
    %c0_23 = arith.constant 0 : index
    %c0_24 = arith.constant 0 : index
    %c0_25 = arith.constant 0 : index
    %c0_26 = arith.constant 0 : index
    %67 = vector.load %arg5[%c0_23, %c0_24, %c0_25, %c0_26] : memref<2x2x64x32xbf16, #tpu.memory_space<vmem>>, vector<1x1x64x32xbf16>
    %68 = vector.shape_cast %67 : vector<1x1x64x32xbf16> to vector<64x32xbf16>
    %cst_27 = arith.constant dense<0.000000e+00> : vector<16x32xf32>
    %69 = tpu.matmul %66, %68, %cst_27 {dimension_numbers = #tpu.dot_dimension_numbers<[1], [0], [0], [1], [0, 0, 1, 1], [], []>} : vector<16x64xbf16>, vector<64x32xbf16>, vector<16x32xf32> -> vector<16x32xf32>
    %70 = arith.addf %37, %69 : vector<16x32xf32>
    %71 = vector.extract_strided_slice %36 {offsets = [0, 64], sizes = [16, 64], strides = [1, 1]} : vector<16x384xf32> to vector<16x64xf32>
    %72 = vector.extract_strided_slice %36 {offsets = [0, 192], sizes = [16, 64], strides = [1, 1]} : vector<16x384xf32> to vector<16x64xf32>
    %73 = vector.extract_strided_slice %36 {offsets = [0, 320], sizes = [16, 64], strides = [1, 1]} : vector<16x384xf32> to vector<16x64xf32>
    %74 = vector.shape_cast %71 : vector<16x64xf32> to vector<2x8x64xf32>
    %75 = arith.truncf %74 : vector<2x8x64xf32> to vector<2x8x64xbf16>
    %76 = vector.shape_cast %72 : vector<16x64xf32> to vector<2x8x64xf32>
    %77 = arith.truncf %76 : vector<2x8x64xf32> to vector<2x8x64xbf16>
    %78 = vector.shape_cast %73 : vector<16x64xf32> to vector<2x8x64xf32>
    %79 = arith.truncf %78 : vector<2x8x64xf32> to vector<2x8x64xbf16>
    "tpu.trace_start"() <{level = 10 : i32, message = "bqd,bkd->bqk"}> : () -> ()
    %cst_28 = arith.constant dense<0.000000e+00> : vector<2x8x8xf32>
    %80 = tpu.matmul %75, %77, %cst_28 {dimension_numbers = #tpu.dot_dimension_numbers<[2], [2], [1], [1], [0, 0, 0, 1, 1, 1], [0], [0]>} : vector<2x8x64xbf16>, vector<2x8x64xbf16>, vector<2x8x8xf32> -> vector<2x8x8xf32>
    "tpu.trace_stop"() : () -> ()
    %cst_29 = arith.constant 1.250000e-01 : f32
    %81 = vector.broadcast %cst_29 : f32 to vector<2x8x8xf32>
    %82 = arith.mulf %80, %81 : vector<2x8x8xf32>
    %83 = vector.shape_cast %5 : vector<8x8xf32> to vector<1x8x8xf32>
    %84 = vector.broadcast %83 : vector<1x8x8xf32> to vector<2x8x8xf32>
    %85 = arith.addf %82, %84 : vector<2x8x8xf32>
    %cst_30 = arith.constant dense<0xFF800000> : vector<2x8xf32>
    %86 = vector.multi_reduction <maximumf>, %85, %cst_30 [2] : vector<2x8x8xf32> to vector<2x8xf32>
    %87 = vector.shape_cast %86 : vector<2x8xf32> to vector<2x8x1xf32>
    %88 = vector.broadcast %87 : vector<2x8x1xf32> to vector<2x8x8xf32>
    %89 = arith.subf %85, %88 : vector<2x8x8xf32>
    %90 = math.exp %89 : vector<2x8x8xf32>
    %cst_31 = arith.constant dense<0.000000e+00> : vector<2x8xf32>
    %91 = vector.multi_reduction <add>, %90, %cst_31 [2] : vector<2x8x8xf32> to vector<2x8xf32>
    %92 = vector.shape_cast %91 : vector<2x8xf32> to vector<2x8x1xf32>
    %93 = tpu.reciprocal %92 {approx = true} : vector<2x8x1xf32> -> vector<2x8x1xf32>
    %94 = vector.broadcast %93 : vector<2x8x1xf32> to vector<2x8x8xf32>
    %95 = arith.mulf %90, %94 : vector<2x8x8xf32>
    %96 = arith.truncf %95 : vector<2x8x8xf32> to vector<2x8x8xbf16>
    "tpu.trace_start"() <{level = 10 : i32, message = "bqk,bkd->bqd"}> : () -> ()
    %cst_32 = arith.constant dense<0.000000e+00> : vector<2x8x64xf32>
    %97 = tpu.matmul %96, %79, %cst_32 {dimension_numbers = #tpu.dot_dimension_numbers<[2], [1], [1], [2], [0, 0, 0, 1, 1, 2], [0], [0]>} : vector<2x8x8xbf16>, vector<2x8x64xbf16>, vector<2x8x64xf32> -> vector<2x8x64xf32>
    "tpu.trace_stop"() : () -> ()
    %98 = vector.shape_cast %97 : vector<2x8x64xf32> to vector<16x64xf32>
    %99 = arith.truncf %98 : vector<16x64xf32> to vector<16x64xbf16>
    %c0_33 = arith.constant 0 : index
    %c1 = arith.constant 1 : index
    %c0_34 = arith.constant 0 : index
    %c0_35 = arith.constant 0 : index
    %100 = vector.load %arg5[%c0_33, %c1, %c0_34, %c0_35] : memref<2x2x64x32xbf16, #tpu.memory_space<vmem>>, vector<1x1x64x32xbf16>
    %101 = vector.shape_cast %100 : vector<1x1x64x32xbf16> to vector<64x32xbf16>
    %cst_36 = arith.constant dense<0.000000e+00> : vector<16x32xf32>
    %102 = tpu.matmul %99, %101, %cst_36 {dimension_numbers = #tpu.dot_dimension_numbers<[1], [0], [0], [1], [0, 0, 1, 1], [], []>} : vector<16x64xbf16>, vector<64x32xbf16>, vector<16x32xf32> -> vector<16x32xf32>
    %103 = arith.addf %70, %102 : vector<16x32xf32>
    %104 = arith.addf %6, %103 : vector<16x32xf32>
    %c0_37 = arith.constant 0 : index
    %c0_38 = arith.constant 0 : index
    %c0_39 = arith.constant 0 : index
    %105 = vector.load %arg6[%c0_37, %c0_38, %c0_39] : memref<2x1x32xf32, #tpu.memory_space<vmem>>, vector<1x1x32xf32>
    %106 = vector.shape_cast %105 : vector<1x1x32xf32> to vector<1x32xf32>
    %107 = vector.broadcast %106 : vector<1x32xf32> to vector<16x32xf32>
    %108 = arith.addf %104, %107 : vector<16x32xf32>
    %c0_40 = arith.constant 0 : index
    %c0_41 = arith.constant 0 : index
    %c0_42 = arith.constant 0 : index
    %109 = vector.load %arg7[%c0_40, %c0_41, %c0_42] : memref<2x1x32xf32, #tpu.memory_space<vmem>>, vector<1x1x32xf32>
    %110 = vector.shape_cast %109 : vector<1x1x32xf32> to vector<1x32xf32>
    %c0_43 = arith.constant 0 : index
    %c0_44 = arith.constant 0 : index
    %c0_45 = arith.constant 0 : index
    %111 = vector.load %arg8[%c0_43, %c0_44, %c0_45] : memref<2x1x32xf32, #tpu.memory_space<vmem>>, vector<1x1x32xf32>
    %112 = vector.shape_cast %111 : vector<1x1x32xf32> to vector<1x32xf32>
    %cst_46 = arith.constant dense<0.000000e+00> : vector<16xf32>
    %113 = vector.multi_reduction <add>, %108, %cst_46 [1] : vector<16x32xf32> to vector<16xf32>
    %114 = vector.shape_cast %113 : vector<16xf32> to vector<16x1xf32>
    %cst_47 = arith.constant 3.200000e+01 : f32
    %115 = vector.broadcast %cst_47 : f32 to vector<16x1xf32>
    %116 = arith.divf %114, %115 : vector<16x1xf32>
    %117 = vector.broadcast %116 : vector<16x1xf32> to vector<16x32xf32>
    %118 = arith.subf %108, %117 : vector<16x32xf32>
    %119 = arith.mulf %118, %118 : vector<16x32xf32>
    %cst_48 = arith.constant dense<0.000000e+00> : vector<16xf32>
    %120 = vector.multi_reduction <add>, %119, %cst_48 [1] : vector<16x32xf32> to vector<16xf32>
    %121 = vector.shape_cast %120 : vector<16xf32> to vector<16x1xf32>
    %cst_49 = arith.constant 3.200000e+01 : f32
    %122 = vector.broadcast %cst_49 : f32 to vector<16x1xf32>
    %123 = arith.divf %121, %122 : vector<16x1xf32>
    %124 = vector.broadcast %116 : vector<16x1xf32> to vector<16x32xf32>
    %125 = arith.subf %108, %124 : vector<16x32xf32>
    %cst_50 = arith.constant 9.99999974E-6 : f32
    %126 = vector.broadcast %cst_50 : f32 to vector<16x1xf32>
    %127 = arith.addf %123, %126 : vector<16x1xf32>
    %128 = math.rsqrt %127 : vector<16x1xf32>
    %129 = vector.broadcast %128 : vector<16x1xf32> to vector<16x32xf32>
    %130 = arith.mulf %125, %129 : vector<16x32xf32>
    %131 = vector.broadcast %110 : vector<1x32xf32> to vector<16x32xf32>
    %132 = arith.mulf %130, %131 : vector<16x32xf32>
    %133 = vector.broadcast %112 : vector<1x32xf32> to vector<16x32xf32>
    %134 = arith.addf %132, %133 : vector<16x32xf32>
    %135 = arith.truncf %134 : vector<16x32xf32> to vector<16x32xbf16>
    %c0_51 = arith.constant 0 : index
    %c0_52 = arith.constant 0 : index
    %c0_53 = arith.constant 0 : index
    %136 = vector.load %arg9[%c0_51, %c0_52, %c0_53] : memref<2x32x64xbf16, #tpu.memory_space<vmem>>, vector<1x32x64xbf16>
    %137 = vector.shape_cast %136 : vector<1x32x64xbf16> to vector<32x64xbf16>
    %cst_54 = arith.constant dense<0.000000e+00> : vector<16x64xf32>
    %138 = tpu.matmul %135, %137, %cst_54 {dimension_numbers = #tpu.dot_dimension_numbers<[1], [0], [0], [1], [0, 0, 1, 1], [], []>} : vector<16x32xbf16>, vector<32x64xbf16>, vector<16x64xf32> -> vector<16x64xf32>
    %c0_55 = arith.constant 0 : index
    %c0_56 = arith.constant 0 : index
    %c0_57 = arith.constant 0 : index
    %139 = vector.load %arg10[%c0_55, %c0_56, %c0_57] : memref<2x1x64xf32, #tpu.memory_space<vmem>>, vector<1x1x64xf32>
    %140 = vector.shape_cast %139 : vector<1x1x64xf32> to vector<1x64xf32>
    %141 = vector.broadcast %140 : vector<1x64xf32> to vector<16x64xf32>
    %142 = arith.addf %138, %141 : vector<16x64xf32>
    %cst_58 = arith.constant 5.000000e-01 : f32
    %143 = vector.broadcast %cst_58 : f32 to vector<16x64xf32>
    %144 = arith.mulf %143, %142 : vector<16x64xf32>
    %cst_59 = arith.constant 0.707106769 : f32
    %145 = vector.broadcast %cst_59 : f32 to vector<16x64xf32>
    %146 = arith.mulf %142, %145 : vector<16x64xf32>
    %147 = math.erf %146 : vector<16x64xf32>
    %cst_60 = arith.constant 1.000000e+00 : f32
    %148 = vector.broadcast %cst_60 : f32 to vector<16x64xf32>
    %149 = arith.addf %148, %147 : vector<16x64xf32>
    %150 = arith.mulf %144, %149 : vector<16x64xf32>
    %151 = arith.truncf %150 : vector<16x64xf32> to vector<16x64xbf16>
    %c0_61 = arith.constant 0 : index
    %c0_62 = arith.constant 0 : index
    %c0_63 = arith.constant 0 : index
    %152 = vector.load %arg11[%c0_61, %c0_62, %c0_63] : memref<2x64x32xbf16, #tpu.memory_space<vmem>>, vector<1x64x32xbf16>
    %153 = vector.shape_cast %152 : vector<1x64x32xbf16> to vector<64x32xbf16>
    %cst_64 = arith.constant dense<0.000000e+00> : vector<16x32xf32>
    %154 = tpu.matmul %151, %153, %cst_64 {dimension_numbers = #tpu.dot_dimension_numbers<[1], [0], [0], [1], [0, 0, 1, 1], [], []>} : vector<16x64xbf16>, vector<64x32xbf16>, vector<16x32xf32> -> vector<16x32xf32>
    %c0_65 = arith.constant 0 : index
    %c0_66 = arith.constant 0 : index
    %c0_67 = arith.constant 0 : index
    %155 = vector.load %arg12[%c0_65, %c0_66, %c0_67] : memref<2x1x32xf32, #tpu.memory_space<vmem>>, vector<1x1x32xf32>
    %156 = vector.shape_cast %155 : vector<1x1x32xf32> to vector<1x32xf32>
    %157 = vector.broadcast %156 : vector<1x32xf32> to vector<16x32xf32>
    %158 = arith.addf %154, %157 : vector<16x32xf32>
    %159 = arith.addf %108, %158 : vector<16x32xf32>
    %c1_68 = arith.constant 1 : index
    %c0_69 = arith.constant 0 : index
    %c0_70 = arith.constant 0 : index
    %160 = vector.load %arg2[%c1_68, %c0_69, %c0_70] : memref<2x1x32xf32, #tpu.memory_space<vmem>>, vector<1x1x32xf32>
    %161 = vector.shape_cast %160 : vector<1x1x32xf32> to vector<1x32xf32>
    %c1_71 = arith.constant 1 : index
    %c0_72 = arith.constant 0 : index
    %c0_73 = arith.constant 0 : index
    %162 = vector.load %arg3[%c1_71, %c0_72, %c0_73] : memref<2x1x32xf32, #tpu.memory_space<vmem>>, vector<1x1x32xf32>
    %163 = vector.shape_cast %162 : vector<1x1x32xf32> to vector<1x32xf32>
    %cst_74 = arith.constant dense<0.000000e+00> : vector<16xf32>
    %164 = vector.multi_reduction <add>, %159, %cst_74 [1] : vector<16x32xf32> to vector<16xf32>
    %165 = vector.shape_cast %164 : vector<16xf32> to vector<16x1xf32>
    %cst_75 = arith.constant 3.200000e+01 : f32
    %166 = vector.broadcast %cst_75 : f32 to vector<16x1xf32>
    %167 = arith.divf %165, %166 : vector<16x1xf32>
    %168 = vector.broadcast %167 : vector<16x1xf32> to vector<16x32xf32>
    %169 = arith.subf %159, %168 : vector<16x32xf32>
    %170 = arith.mulf %169, %169 : vector<16x32xf32>
    %cst_76 = arith.constant dense<0.000000e+00> : vector<16xf32>
    %171 = vector.multi_reduction <add>, %170, %cst_76 [1] : vector<16x32xf32> to vector<16xf32>
    %172 = vector.shape_cast %171 : vector<16xf32> to vector<16x1xf32>
    %cst_77 = arith.constant 3.200000e+01 : f32
    %173 = vector.broadcast %cst_77 : f32 to vector<16x1xf32>
    %174 = arith.divf %172, %173 : vector<16x1xf32>
    %175 = vector.broadcast %167 : vector<16x1xf32> to vector<16x32xf32>
    %176 = arith.subf %159, %175 : vector<16x32xf32>
    %cst_78 = arith.constant 9.99999974E-6 : f32
    %177 = vector.broadcast %cst_78 : f32 to vector<16x1xf32>
    %178 = arith.addf %174, %177 : vector<16x1xf32>
    %179 = math.rsqrt %178 : vector<16x1xf32>
    %180 = vector.broadcast %179 : vector<16x1xf32> to vector<16x32xf32>
    %181 = arith.mulf %176, %180 : vector<16x32xf32>
    %182 = vector.broadcast %161 : vector<1x32xf32> to vector<16x32xf32>
    %183 = arith.mulf %181, %182 : vector<16x32xf32>
    %184 = vector.broadcast %163 : vector<1x32xf32> to vector<16x32xf32>
    %185 = arith.addf %183, %184 : vector<16x32xf32>
    %186 = arith.truncf %185 : vector<16x32xf32> to vector<16x32xbf16>
    %c1_79 = arith.constant 1 : index
    %c0_80 = arith.constant 0 : index
    %c0_81 = arith.constant 0 : index
    %187 = vector.load %arg4[%c1_79, %c0_80, %c0_81] : memref<2x32x384xbf16, #tpu.memory_space<vmem>>, vector<1x32x384xbf16>
    %188 = vector.shape_cast %187 : vector<1x32x384xbf16> to vector<32x384xbf16>
    %cst_82 = arith.constant dense<0.000000e+00> : vector<16x384xf32>
    %189 = tpu.matmul %186, %188, %cst_82 {dimension_numbers = #tpu.dot_dimension_numbers<[1], [0], [0], [1], [0, 0, 1, 1], [], []>} : vector<16x32xbf16>, vector<32x384xbf16>, vector<16x384xf32> -> vector<16x384xf32>
    %cst_83 = arith.constant 0.000000e+00 : f32
    %190 = vector.broadcast %cst_83 : f32 to vector<16x32xf32>
    %191 = vector.extract_strided_slice %189 {offsets = [0, 0], sizes = [16, 64], strides = [1, 1]} : vector<16x384xf32> to vector<16x64xf32>
    %192 = vector.extract_strided_slice %189 {offsets = [0, 128], sizes = [16, 64], strides = [1, 1]} : vector<16x384xf32> to vector<16x64xf32>
    %193 = vector.extract_strided_slice %189 {offsets = [0, 256], sizes = [16, 64], strides = [1, 1]} : vector<16x384xf32> to vector<16x64xf32>
    %194 = vector.shape_cast %191 : vector<16x64xf32> to vector<2x8x64xf32>
    %195 = arith.truncf %194 : vector<2x8x64xf32> to vector<2x8x64xbf16>
    %196 = vector.shape_cast %192 : vector<16x64xf32> to vector<2x8x64xf32>
    %197 = arith.truncf %196 : vector<2x8x64xf32> to vector<2x8x64xbf16>
    %198 = vector.shape_cast %193 : vector<16x64xf32> to vector<2x8x64xf32>
    %199 = arith.truncf %198 : vector<2x8x64xf32> to vector<2x8x64xbf16>
    "tpu.trace_start"() <{level = 10 : i32, message = "bqd,bkd->bqk"}> : () -> ()
    %cst_84 = arith.constant dense<0.000000e+00> : vector<2x8x8xf32>
    %200 = tpu.matmul %195, %197, %cst_84 {dimension_numbers = #tpu.dot_dimension_numbers<[2], [2], [1], [1], [0, 0, 0, 1, 1, 1], [0], [0]>} : vector<2x8x64xbf16>, vector<2x8x64xbf16>, vector<2x8x8xf32> -> vector<2x8x8xf32>
    "tpu.trace_stop"() : () -> ()
    %cst_85 = arith.constant 1.250000e-01 : f32
    %201 = vector.broadcast %cst_85 : f32 to vector<2x8x8xf32>
    %202 = arith.mulf %200, %201 : vector<2x8x8xf32>
    %203 = vector.shape_cast %5 : vector<8x8xf32> to vector<1x8x8xf32>
    %204 = vector.broadcast %203 : vector<1x8x8xf32> to vector<2x8x8xf32>
    %205 = arith.addf %202, %204 : vector<2x8x8xf32>
    %cst_86 = arith.constant dense<0xFF800000> : vector<2x8xf32>
    %206 = vector.multi_reduction <maximumf>, %205, %cst_86 [2] : vector<2x8x8xf32> to vector<2x8xf32>
    %207 = vector.shape_cast %206 : vector<2x8xf32> to vector<2x8x1xf32>
    %208 = vector.broadcast %207 : vector<2x8x1xf32> to vector<2x8x8xf32>
    %209 = arith.subf %205, %208 : vector<2x8x8xf32>
    %210 = math.exp %209 : vector<2x8x8xf32>
    %cst_87 = arith.constant dense<0.000000e+00> : vector<2x8xf32>
    %211 = vector.multi_reduction <add>, %210, %cst_87 [2] : vector<2x8x8xf32> to vector<2x8xf32>
    %212 = vector.shape_cast %211 : vector<2x8xf32> to vector<2x8x1xf32>
    %213 = tpu.reciprocal %212 {approx = true} : vector<2x8x1xf32> -> vector<2x8x1xf32>
    %214 = vector.broadcast %213 : vector<2x8x1xf32> to vector<2x8x8xf32>
    %215 = arith.mulf %210, %214 : vector<2x8x8xf32>
    %216 = arith.truncf %215 : vector<2x8x8xf32> to vector<2x8x8xbf16>
    "tpu.trace_start"() <{level = 10 : i32, message = "bqk,bkd->bqd"}> : () -> ()
    %cst_88 = arith.constant dense<0.000000e+00> : vector<2x8x64xf32>
    %217 = tpu.matmul %216, %199, %cst_88 {dimension_numbers = #tpu.dot_dimension_numbers<[2], [1], [1], [2], [0, 0, 0, 1, 1, 2], [0], [0]>} : vector<2x8x8xbf16>, vector<2x8x64xbf16>, vector<2x8x64xf32> -> vector<2x8x64xf32>
    "tpu.trace_stop"() : () -> ()
    %218 = vector.shape_cast %217 : vector<2x8x64xf32> to vector<16x64xf32>
    %219 = arith.truncf %218 : vector<16x64xf32> to vector<16x64xbf16>
    %c1_89 = arith.constant 1 : index
    %c0_90 = arith.constant 0 : index
    %c0_91 = arith.constant 0 : index
    %c0_92 = arith.constant 0 : index
    %220 = vector.load %arg5[%c1_89, %c0_90, %c0_91, %c0_92] : memref<2x2x64x32xbf16, #tpu.memory_space<vmem>>, vector<1x1x64x32xbf16>
    %221 = vector.shape_cast %220 : vector<1x1x64x32xbf16> to vector<64x32xbf16>
    %cst_93 = arith.constant dense<0.000000e+00> : vector<16x32xf32>
    %222 = tpu.matmul %219, %221, %cst_93 {dimension_numbers = #tpu.dot_dimension_numbers<[1], [0], [0], [1], [0, 0, 1, 1], [], []>} : vector<16x64xbf16>, vector<64x32xbf16>, vector<16x32xf32> -> vector<16x32xf32>
    %223 = arith.addf %190, %222 : vector<16x32xf32>
    %224 = vector.extract_strided_slice %189 {offsets = [0, 64], sizes = [16, 64], strides = [1, 1]} : vector<16x384xf32> to vector<16x64xf32>
    %225 = vector.extract_strided_slice %189 {offsets = [0, 192], sizes = [16, 64], strides = [1, 1]} : vector<16x384xf32> to vector<16x64xf32>
    %226 = vector.extract_strided_slice %189 {offsets = [0, 320], sizes = [16, 64], strides = [1, 1]} : vector<16x384xf32> to vector<16x64xf32>
    %227 = vector.shape_cast %224 : vector<16x64xf32> to vector<2x8x64xf32>
    %228 = arith.truncf %227 : vector<2x8x64xf32> to vector<2x8x64xbf16>
    %229 = vector.shape_cast %225 : vector<16x64xf32> to vector<2x8x64xf32>
    %230 = arith.truncf %229 : vector<2x8x64xf32> to vector<2x8x64xbf16>
    %231 = vector.shape_cast %226 : vector<16x64xf32> to vector<2x8x64xf32>
    %232 = arith.truncf %231 : vector<2x8x64xf32> to vector<2x8x64xbf16>
    "tpu.trace_start"() <{level = 10 : i32, message = "bqd,bkd->bqk"}> : () -> ()
    %cst_94 = arith.constant dense<0.000000e+00> : vector<2x8x8xf32>
    %233 = tpu.matmul %228, %230, %cst_94 {dimension_numbers = #tpu.dot_dimension_numbers<[2], [2], [1], [1], [0, 0, 0, 1, 1, 1], [0], [0]>} : vector<2x8x64xbf16>, vector<2x8x64xbf16>, vector<2x8x8xf32> -> vector<2x8x8xf32>
    "tpu.trace_stop"() : () -> ()
    %cst_95 = arith.constant 1.250000e-01 : f32
    %234 = vector.broadcast %cst_95 : f32 to vector<2x8x8xf32>
    %235 = arith.mulf %233, %234 : vector<2x8x8xf32>
    %236 = vector.shape_cast %5 : vector<8x8xf32> to vector<1x8x8xf32>
    %237 = vector.broadcast %236 : vector<1x8x8xf32> to vector<2x8x8xf32>
    %238 = arith.addf %235, %237 : vector<2x8x8xf32>
    %cst_96 = arith.constant dense<0xFF800000> : vector<2x8xf32>
    %239 = vector.multi_reduction <maximumf>, %238, %cst_96 [2] : vector<2x8x8xf32> to vector<2x8xf32>
    %240 = vector.shape_cast %239 : vector<2x8xf32> to vector<2x8x1xf32>
    %241 = vector.broadcast %240 : vector<2x8x1xf32> to vector<2x8x8xf32>
    %242 = arith.subf %238, %241 : vector<2x8x8xf32>
    %243 = math.exp %242 : vector<2x8x8xf32>
    %cst_97 = arith.constant dense<0.000000e+00> : vector<2x8xf32>
    %244 = vector.multi_reduction <add>, %243, %cst_97 [2] : vector<2x8x8xf32> to vector<2x8xf32>
    %245 = vector.shape_cast %244 : vector<2x8xf32> to vector<2x8x1xf32>
    %246 = tpu.reciprocal %245 {approx = true} : vector<2x8x1xf32> -> vector<2x8x1xf32>
    %247 = vector.broadcast %246 : vector<2x8x1xf32> to vector<2x8x8xf32>
    %248 = arith.mulf %243, %247 : vector<2x8x8xf32>
    %249 = arith.truncf %248 : vector<2x8x8xf32> to vector<2x8x8xbf16>
    "tpu.trace_start"() <{level = 10 : i32, message = "bqk,bkd->bqd"}> : () -> ()
    %cst_98 = arith.constant dense<0.000000e+00> : vector<2x8x64xf32>
    %250 = tpu.matmul %249, %232, %cst_98 {dimension_numbers = #tpu.dot_dimension_numbers<[2], [1], [1], [2], [0, 0, 0, 1, 1, 2], [0], [0]>} : vector<2x8x8xbf16>, vector<2x8x64xbf16>, vector<2x8x64xf32> -> vector<2x8x64xf32>
    "tpu.trace_stop"() : () -> ()
    %251 = vector.shape_cast %250 : vector<2x8x64xf32> to vector<16x64xf32>
    %252 = arith.truncf %251 : vector<16x64xf32> to vector<16x64xbf16>
    %c1_99 = arith.constant 1 : index
    %c1_100 = arith.constant 1 : index
    %c0_101 = arith.constant 0 : index
    %c0_102 = arith.constant 0 : index
    %253 = vector.load %arg5[%c1_99, %c1_100, %c0_101, %c0_102] : memref<2x2x64x32xbf16, #tpu.memory_space<vmem>>, vector<1x1x64x32xbf16>
    %254 = vector.shape_cast %253 : vector<1x1x64x32xbf16> to vector<64x32xbf16>
    %cst_103 = arith.constant dense<0.000000e+00> : vector<16x32xf32>
    %255 = tpu.matmul %252, %254, %cst_103 {dimension_numbers = #tpu.dot_dimension_numbers<[1], [0], [0], [1], [0, 0, 1, 1], [], []>} : vector<16x64xbf16>, vector<64x32xbf16>, vector<16x32xf32> -> vector<16x32xf32>
    %256 = arith.addf %223, %255 : vector<16x32xf32>
    %257 = arith.addf %159, %256 : vector<16x32xf32>
    %c1_104 = arith.constant 1 : index
    %c0_105 = arith.constant 0 : index
    %c0_106 = arith.constant 0 : index
    %258 = vector.load %arg6[%c1_104, %c0_105, %c0_106] : memref<2x1x32xf32, #tpu.memory_space<vmem>>, vector<1x1x32xf32>
    %259 = vector.shape_cast %258 : vector<1x1x32xf32> to vector<1x32xf32>
    %260 = vector.broadcast %259 : vector<1x32xf32> to vector<16x32xf32>
    %261 = arith.addf %257, %260 : vector<16x32xf32>
    %c1_107 = arith.constant 1 : index
    %c0_108 = arith.constant 0 : index
    %c0_109 = arith.constant 0 : index
    %262 = vector.load %arg7[%c1_107, %c0_108, %c0_109] : memref<2x1x32xf32, #tpu.memory_space<vmem>>, vector<1x1x32xf32>
    %263 = vector.shape_cast %262 : vector<1x1x32xf32> to vector<1x32xf32>
    %c1_110 = arith.constant 1 : index
    %c0_111 = arith.constant 0 : index
    %c0_112 = arith.constant 0 : index
    %264 = vector.load %arg8[%c1_110, %c0_111, %c0_112] : memref<2x1x32xf32, #tpu.memory_space<vmem>>, vector<1x1x32xf32>
    %265 = vector.shape_cast %264 : vector<1x1x32xf32> to vector<1x32xf32>
    %cst_113 = arith.constant dense<0.000000e+00> : vector<16xf32>
    %266 = vector.multi_reduction <add>, %261, %cst_113 [1] : vector<16x32xf32> to vector<16xf32>
    %267 = vector.shape_cast %266 : vector<16xf32> to vector<16x1xf32>
    %cst_114 = arith.constant 3.200000e+01 : f32
    %268 = vector.broadcast %cst_114 : f32 to vector<16x1xf32>
    %269 = arith.divf %267, %268 : vector<16x1xf32>
    %270 = vector.broadcast %269 : vector<16x1xf32> to vector<16x32xf32>
    %271 = arith.subf %261, %270 : vector<16x32xf32>
    %272 = arith.mulf %271, %271 : vector<16x32xf32>
    %cst_115 = arith.constant dense<0.000000e+00> : vector<16xf32>
    %273 = vector.multi_reduction <add>, %272, %cst_115 [1] : vector<16x32xf32> to vector<16xf32>
    %274 = vector.shape_cast %273 : vector<16xf32> to vector<16x1xf32>
    %cst_116 = arith.constant 3.200000e+01 : f32
    %275 = vector.broadcast %cst_116 : f32 to vector<16x1xf32>
    %276 = arith.divf %274, %275 : vector<16x1xf32>
    %277 = vector.broadcast %269 : vector<16x1xf32> to vector<16x32xf32>
    %278 = arith.subf %261, %277 : vector<16x32xf32>
    %cst_117 = arith.constant 9.99999974E-6 : f32
    %279 = vector.broadcast %cst_117 : f32 to vector<16x1xf32>
    %280 = arith.addf %276, %279 : vector<16x1xf32>
    %281 = math.rsqrt %280 : vector<16x1xf32>
    %282 = vector.broadcast %281 : vector<16x1xf32> to vector<16x32xf32>
    %283 = arith.mulf %278, %282 : vector<16x32xf32>
    %284 = vector.broadcast %263 : vector<1x32xf32> to vector<16x32xf32>
    %285 = arith.mulf %283, %284 : vector<16x32xf32>
    %286 = vector.broadcast %265 : vector<1x32xf32> to vector<16x32xf32>
    %287 = arith.addf %285, %286 : vector<16x32xf32>
    %288 = arith.truncf %287 : vector<16x32xf32> to vector<16x32xbf16>
    %c1_118 = arith.constant 1 : index
    %c0_119 = arith.constant 0 : index
    %c0_120 = arith.constant 0 : index
    %289 = vector.load %arg9[%c1_118, %c0_119, %c0_120] : memref<2x32x64xbf16, #tpu.memory_space<vmem>>, vector<1x32x64xbf16>
    %290 = vector.shape_cast %289 : vector<1x32x64xbf16> to vector<32x64xbf16>
    %cst_121 = arith.constant dense<0.000000e+00> : vector<16x64xf32>
    %291 = tpu.matmul %288, %290, %cst_121 {dimension_numbers = #tpu.dot_dimension_numbers<[1], [0], [0], [1], [0, 0, 1, 1], [], []>} : vector<16x32xbf16>, vector<32x64xbf16>, vector<16x64xf32> -> vector<16x64xf32>
    %c1_122 = arith.constant 1 : index
    %c0_123 = arith.constant 0 : index
    %c0_124 = arith.constant 0 : index
    %292 = vector.load %arg10[%c1_122, %c0_123, %c0_124] : memref<2x1x64xf32, #tpu.memory_space<vmem>>, vector<1x1x64xf32>
    %293 = vector.shape_cast %292 : vector<1x1x64xf32> to vector<1x64xf32>
    %294 = vector.broadcast %293 : vector<1x64xf32> to vector<16x64xf32>
    %295 = arith.addf %291, %294 : vector<16x64xf32>
    %cst_125 = arith.constant 5.000000e-01 : f32
    %296 = vector.broadcast %cst_125 : f32 to vector<16x64xf32>
    %297 = arith.mulf %296, %295 : vector<16x64xf32>
    %cst_126 = arith.constant 0.707106769 : f32
    %298 = vector.broadcast %cst_126 : f32 to vector<16x64xf32>
    %299 = arith.mulf %295, %298 : vector<16x64xf32>
    %300 = math.erf %299 : vector<16x64xf32>
    %cst_127 = arith.constant 1.000000e+00 : f32
    %301 = vector.broadcast %cst_127 : f32 to vector<16x64xf32>
    %302 = arith.addf %301, %300 : vector<16x64xf32>
    %303 = arith.mulf %297, %302 : vector<16x64xf32>
    %304 = arith.truncf %303 : vector<16x64xf32> to vector<16x64xbf16>
    %c1_128 = arith.constant 1 : index
    %c0_129 = arith.constant 0 : index
    %c0_130 = arith.constant 0 : index
    %305 = vector.load %arg11[%c1_128, %c0_129, %c0_130] : memref<2x64x32xbf16, #tpu.memory_space<vmem>>, vector<1x64x32xbf16>
    %306 = vector.shape_cast %305 : vector<1x64x32xbf16> to vector<64x32xbf16>
    %cst_131 = arith.constant dense<0.000000e+00> : vector<16x32xf32>
    %307 = tpu.matmul %304, %306, %cst_131 {dimension_numbers = #tpu.dot_dimension_numbers<[1], [0], [0], [1], [0, 0, 1, 1], [], []>} : vector<16x64xbf16>, vector<64x32xbf16>, vector<16x32xf32> -> vector<16x32xf32>
    %c1_132 = arith.constant 1 : index
    %c0_133 = arith.constant 0 : index
    %c0_134 = arith.constant 0 : index
    %308 = vector.load %arg12[%c1_132, %c0_133, %c0_134] : memref<2x1x32xf32, #tpu.memory_space<vmem>>, vector<1x1x32xf32>
    %309 = vector.shape_cast %308 : vector<1x1x32xf32> to vector<1x32xf32>
    %310 = vector.broadcast %309 : vector<1x32xf32> to vector<16x32xf32>
    %311 = arith.addf %307, %310 : vector<16x32xf32>
    %312 = arith.addf %261, %311 : vector<16x32xf32>
    %c0_135 = arith.constant 0 : index
    %c0_136 = arith.constant 0 : index
    %313 = vector.load %arg13[%c0_135, %c0_136] : memref<16x32xf32, #tpu.memory_space<vmem>>, vector<16x32xf32>
    tpu.vector_store %arg13[%c0_135, %c0_136], %312 {strides = array<i32>} : memref<16x32xf32, #tpu.memory_space<vmem>>, vector<16x32xf32>,
    return
  }
  func.func @transform_0(%arg0: i32) -> (i32, i32) {
    %c0_i32 = arith.constant 0 : i32
    %c0_i32_0 = arith.constant 0 : i32
    %c0_i32_1 = arith.constant 0 : i32
    return %c0_i32, %c0_i32_0 : i32, i32
  }
  func.func @transform_1(%arg0: i32) -> (i32, i32, i32) {
    %c0_i32 = arith.constant 0 : i32
    %c0_i32_0 = arith.constant 0 : i32
    %c0_i32_1 = arith.constant 0 : i32
    %c0_i32_2 = arith.constant 0 : i32
    return %c0_i32, %c0_i32_0, %c0_i32_1 : i32, i32, i32
  }
  func.func @transform_2(%arg0: i32) -> (i32, i32, i32) {
    %c0_i32 = arith.constant 0 : i32
    %c0_i32_0 = arith.constant 0 : i32
    %c0_i32_1 = arith.constant 0 : i32
    %c0_i32_2 = arith.constant 0 : i32
    return %c0_i32, %c0_i32_0, %c0_i32_1 : i32, i32, i32
  }
  func.func @transform_3(%arg0: i32) -> (i32, i32, i32) {
    %c0_i32 = arith.constant 0 : i32
    %c0_i32_0 = arith.constant 0 : i32
    %c0_i32_1 = arith.constant 0 : i32
    %c0_i32_2 = arith.constant 0 : i32
    return %c0_i32, %c0_i32_0, %c0_i32_1 : i32, i32, i32
  }
  func.func @transform_4(%arg0: i32) -> (i32, i32, i32, i32) {
    %c0_i32 = arith.constant 0 : i32
    %c0_i32_0 = arith.constant 0 : i32
    %c0_i32_1 = arith.constant 0 : i32
    %c0_i32_2 = arith.constant 0 : i32
    %c0_i32_3 = arith.constant 0 : i32
    return %c0_i32, %c0_i32_0, %c0_i32_1, %c0_i32_2 : i32, i32, i32, i32
  }
  func.func @transform_5(%arg0: i32) -> (i32, i32, i32) {
    %c0_i32 = arith.constant 0 : i32
    %c0_i32_0 = arith.constant 0 : i32
    %c0_i32_1 = arith.constant 0 : i32
    %c0_i32_2 = arith.constant 0 : i32
    return %c0_i32, %c0_i32_0, %c0_i32_1 : i32, i32, i32
  }
  func.func @transform_6(%arg0: i32) -> (i32, i32, i32) {
    %c0_i32 = arith.constant 0 : i32
    %c0_i32_0 = arith.constant 0 : i32
    %c0_i32_1 = arith.constant 0 : i32
    %c0_i32_2 = arith.constant 0 : i32
    return %c0_i32, %c0_i32_0, %c0_i32_1 : i32, i32, i32
  }
  func.func @transform_7(%arg0: i32) -> (i32, i32, i32) {
    %c0_i32 = arith.constant 0 : i32
    %c0_i32_0 = arith.constant 0 : i32
    %c0_i32_1 = arith.constant 0 : i32
    %c0_i32_2 = arith.constant 0 : i32
    return %c0_i32, %c0_i32_0, %c0_i32_1 : i32, i32, i32
  }
  func.func @transform_8(%arg0: i32) -> (i32, i32, i32) {
    %c0_i32 = arith.constant 0 : i32
    %c0_i32_0 = arith.constant 0 : i32
    %c0_i32_1 = arith.constant 0 : i32
    %c0_i32_2 = arith.constant 0 : i32
    return %c0_i32, %c0_i32_0, %c0_i32_1 : i32, i32, i32
  }
  func.func @transform_9(%arg0: i32) -> (i32, i32, i32) {
    %c0_i32 = arith.constant 0 : i32
    %c0_i32_0 = arith.constant 0 : i32
    %c0_i32_1 = arith.constant 0 : i32
    %c0_i32_2 = arith.constant 0 : i32
    return %c0_i32, %c0_i32_0, %c0_i32_1 : i32, i32, i32
  }
  func.func @transform_10(%arg0: i32) -> (i32, i32, i32) {
    %c0_i32 = arith.constant 0 : i32
    %c0_i32_0 = arith.constant 0 : i32
    %c0_i32_1 = arith.constant 0 : i32
    %c0_i32_2 = arith.constant 0 : i32
    return %c0_i32, %c0_i32_0, %c0_i32_1 : i32, i32, i32
  }
  func.func @transform_11(%arg0: i32) -> (i32, i32, i32) {
    %c0_i32 = arith.constant 0 : i32
    %c0_i32_0 = arith.constant 0 : i32
    %c0_i32_1 = arith.constant 0 : i32
    %c0_i32_2 = arith.constant 0 : i32
    return %c0_i32, %c0_i32_0, %c0_i32_1 : i32, i32, i32
  }
  func.func @transform_12(%arg0: i32) -> (i32, i32) {
    %c0_i32 = arith.constant 0 : i32
    %c0_i32_0 = arith.constant 0 : i32
    %c0_i32_1 = arith.constant 0 : i32
    return %c0_i32, %c0_i32_0 : i32, i32
  }
}

</mosaic_0001>

<bundles_post_ra>
// kernel: tpu_custom_call.1
= control target key start
LH: loop header
LB: loop body
LE: loop exit
PB: predicated region body
PF: predicated region fallthrough
CT: control target
= control target key end

     0   :  { %17 = vsyncpa [#allocation3], 0  ;;  %s2482_s0 = inlined_call_operand.hbm [shape: f32[16,32], index: 0, kind: input, shape index: {}, may-alias: {0,12}]   ;;  %s2483_s1 = inlined_call_operand.vmem [shape: f32[2,1,32], index: 1, kind: input, shape index: {}]   ;;  %s2484_s2 = inlined_call_operand.vmem [shape: f32[2,1,32], index: 2, kind: input, shape index: {}]   ;;  %s2485_s3 = inlined_call_operand.vmem [shape: bf16[2,32,384], index: 3, kind: input, shape index: {}]   ;;  %s2486_s4 = inlined_call_operand.vmem [shape: bf16[2,2,64,32], index: 4, kind: input, shape index: {}]   ;;  %s2487_s5 = inlined_call_operand.vmem [shape: f32[2,1,32], index: 5, kind: input, shape index: {}]   ;;  %s2488_s6 = inlined_call_operand.vmem [shape: f32[2,1,32], index: 6, kind: input, shape index: {}]   ;;  %s2489_s7 = inlined_call_operand.vmem [shape: f32[2,1,32], index: 7, kind: input, shape index: {}]   ;;  %s2490_s8 = inlined_call_operand.vmem [shape: bf16[2,32,64], index: 8, kind: input, shape index: {}]   ;;  %s2491_s9 = inlined_call_operand.vmem [shape: f32[2,1,64], index: 9, kind: input, shape index: {}]   ;;  %s2492_s10 = inlined_call_operand.vmem [shape: bf16[2,64,32], index: 10, kind: input, shape index: {}]   ;;  %s2493_s11 = inlined_call_operand.vmem [shape: f32[2,1,32], index: 11, kind: input, shape index: {}]   ;;  %s2494_s12 = inlined_call_operand.hbm [shape: f32[16,32], index: 12, kind: output, shape index: {}, may-alias: {0,12}]  }
   0x1   :  { %18 = vsyncpa [#allocation4], 0  ;;  %s23_s23 = sshll.u32 %s2482_s0, 4  ;;  %s1992_s24 = smov [#allocation2]   ;;  %s24_s23 = int_to_ptr.hbm [resolvable:$true] %s23_s23 }
   0x2   :  { %s25_s25 = sshll.u32 %s1992_s24, 4  ;;  %s1993_s26 = smov 128   ;;  %s26_s25 = int_to_ptr.vmem [resolvable:$true] %s25_s25 }
   0x3   :  { %s1994_s27 = smov 8  }
   0x4   :  { %31 = dma.hbm_to_vmem [thread:$0]  %s24_s23, 256, %s26_s25, [#allocation3], %s1993_s26, %s1993_s26, %s1994_s27  }
   0x5   :  { %1988 = dma.done.wait [#allocation3], 256  }
   0x6   :  { %1989 = vsyncadd [#allocation3], 4294967040  ;;  %vm69_vm0 = vcmask 261120   ;;  %v2070_v0 = vld [vmem:[#allocation2] sm:$0xff]  ;;  %v2074_v2 = vld [vmem:[#allocation2 + $0x8] sm:$0xff]  ;;  %v1995_v4 = vmov 32.0  }
   0x7   :  { %v70_v1 = vsel %vm69_vm0, %v2070_v0, 0.0  ;;  %v73_v3 = vsel %vm69_vm0, %v2074_v2, 0.0  ;;  %1882 = vrcp.f32 %v1995_v4  ;;  %v1590_v21 = vld [vmem:[%s2485_s3 + $0x18] sm:$0xf]  ;;  %v1825_v22 = vld [vmem:[%s2485_s3 + $0x20] sm:$0xf0] }
   0x8   :  { %71 = vadd.xlane.f32.xlu0 %v70_v1  ;;  %v1824_v23 = vld [vmem:[%s2485_s3 + $0x1c] sm:$0xf]  ;;  %v1591_v24 = vor.u32 %v1825_v22, %v1590_v21  ;;  %v1592_v25 = vld [vmem:[%s2485_s3 + $0x24] sm:$0xf0]  ;;  %v1598_v26 = vld [vmem:[%s2485_s3 + $0x20] sm:$0xf] }
   0x9   :  { %v1826_v27 = vld [vmem:[%s2485_s3 + $0x28] sm:$0xf0]  ;;  %v1595_v28 = vor.u32 %v1824_v23, %v1592_v25  ;;  %v1578_v30 = vld [vmem:[%s2485_s3] sm:$0xf]  ;;  %v1821_v32 = vld [vmem:[%s2485_s3 + $0x4] sm:$0xf] }
   0xa   :  { %v1599_v29 = vor.u32 %v1826_v27, %v1598_v26  ;;  %v1822_v31 = vld [vmem:[%s2485_s3 + $0x8] sm:$0xf0]  ;;  %181 = vmatpush.bf16.msra.mxu0 %v1591_v24  ;;  %v1580_v35 = vld [vmem:[%s2485_s3 + $0xc] sm:$0xf0]  ;;  %v1586_v36 = vld [vmem:[%s2485_s3 + $0x8] sm:$0xf] }
   0xb   :  { %v1579_v34 = vor.u32 %v1822_v31, %v1578_v30  ;;  %v1823_v37 = vld [vmem:[%s2485_s3 + $0x10] sm:$0xf0]  ;;  %195 = vmatpush.bf16.msra.mxu1 %v1595_v28  ;;  %v1583_v39 = vor.u32 %v1821_v32, %v1580_v35  ;;  %v1868_v58 = vld [vmem:[%s2483_s1] ss:$0 sm:$0xff]  ;;  %vm223_vm8 = vcmask 523264   ;;  %s1996_s20 = smov 64  }
   0xc   :  { %209 = vmatpush.bf16.msra.mxu2 %v1599_v29  ;;  %v1587_v40 = vor.u32 %v1823_v37, %v1586_v36  ;;  %v1869_v63 = vld [vmem:[%s2484_s2] ss:$0 sm:$0xff]  ;;  %vm294_vm9 = vcmask 1043456   ;;  %v59_v37 = vlaneseq  ;;  %vm266_vm11 = vcmask 64512   ;;  %s1998_s13 = smov [#allocation5]   ;;  %s1563_s17 = sshll.u32 %s2494_s12, 4  ;;  %s1564_s17 = int_to_ptr.hbm [resolvable:$true] %s1563_s17 }
   0xd   :  { %v1883_v5 = vpop.eup %1882  ;;  %s1561_s14 = sshll.u32 %s1998_s13, 4  ;;  %s1562_s14 = int_to_ptr.vmem [resolvable:$true] %s1561_s14 }
   0xe   :  { %v77_v6 = vmul.f32 32.0, %v1883_v5  ;;  %vm81_vm1 = vweird.f32 %v1883_v5  ;;  %182 = vmatpush.bf16.msra.mxu0 %v1579_v34 }
   0xf   :  { %196 = vmatpush.bf16.msra.mxu1 %v1583_v39  ;;  %v62_v39 = vand.u32 127, %v59_v37 }
  0x10   :  { %74 = vadd.xlane.f32.xlu0 %v73_v3  ;;  %v78_v7 = vsub.f32 1.0, %v77_v6  ;;  %210 = vmatpush.bf16.msra.mxu2 %v1587_v40 }
  0x12   :  { %v79_v8 = vmul.f32 %v1883_v5, %v78_v7 }
  0x14   :  { %v80_v9 = vadd.f32 %v1883_v5, %v79_v8 }
  0x16   :  { %v2078_v10 = vsel %vm81_vm1, %v1883_v5, %v80_v9 }
  0x7b   :  { %v72_v11 = vpop.xlane.xlu0 %71 }
  0x7c   :  { %v83_v12 = vmul.f32 %v2078_v10, %v72_v11 }
  0x7e   :  { %v85_v13 = vsub.f32 %v2070_v0, %v83_v12 }
  0x80   :  { %v87_v14 = vmul.f32 %v85_v13, %v85_v13 }
  0x82   :  { %v89_v15 = vsel %vm69_vm0, %v87_v14, 0.0 }
  0x83   :  { %90 = vadd.xlane.f32.xlu1 %v89_v15  ;;  %v75_v16 = vpop.xlane.xlu0 %74 }
  0x84   :  { %v84_v17 = vmul.f32 %v2078_v10, %v75_v16 }
  0x86   :  { %v86_v18 = vsub.f32 %v2074_v2, %v84_v17 }
  0x88   :  { %v88_v19 = vmul.f32 %v86_v18, %v86_v18 }
  0x8a   :  { %v92_v20 = vsel %vm69_vm0, %v88_v19, 0.0 }
  0x8b   :  { %93 = vadd.xlane.f32.xlu1 %v92_v20 }
  0xf6   :  { %v91_v33 = vpop.xlane.xlu1 %90 }
  0xf7   :  { %v95_v38 = vmul.f32 %v91_v33, %v2078_v10 }
  0xf9   :  { %v97_v41 = vadd.f32 1e-05, %v95_v38  ;;  %v60_v38 = vshrl.u32 %v59_v37, 7  ;;  %v1828_v37 = vld [vmem:[%s2486_s4 + $0x8] sm:$0xff] }
  0xfb   :  { %1884 = vrsqrt.f32 %v97_v41  ;;  %vm105_vm3 = vweird.f32 %v97_v41  ;;  %vm63_vm10 = vcmp.gt.s32.totalorder %v62_v39, %v60_v38  ;;  %v1827_v39 = vld [vmem:[%s2486_s4] sm:$0xff] }
  0xfe   :  { %v94_v42 = vpop.xlane.xlu1 %93 }
  0xff   :  { %v96_v43 = vmul.f32 %v94_v42, %v2078_v10 }
 0x101   :  { %v1885_v44 = vpop.eup %1884  ;;  %v98_v45 = vadd.f32 1e-05, %v96_v43 }
 0x102   :  { %v100_v46 = vmul.f32 %v1885_v44, %v97_v41  ;;  %vm106_vm2 = vweird.f32 %v1885_v44  ;;  %v1997_v41 = vmov 0.0  }
 0x103   :  { %1886 = vrsqrt.f32 %v98_v45  ;;  %vm107_vm4 = vmor %vm105_vm3, %vm106_vm2  ;;  %vm115_vm6 = vweird.f32 %v98_v45  ;;  %v2150_v42 = vsel %vm63_vm10, -1e+30, %v1997_v41 }
 0x104   :  { %v101_v47 = vmul.f32 %v1885_v44, %v100_v46 }
 0x106   :  { %v102_v48 = vmul.f32 0.5, %v101_v47 }
 0x108   :  { %v103_v49 = vsub.f32 1.5, %v102_v48 }
 0x109   :  { %v1887_v50 = vpop.eup %1886 }
 0x10a   :  { %v104_v51 = vmul.f32 %v1885_v44, %v103_v49  ;;  %v110_v52 = vmul.f32 %v1887_v50, %v98_v45  ;;  %vm116_vm5 = vweird.f32 %v1887_v50 }
 0x10b   :  { %vm117_vm7 = vmor %vm115_vm6, %vm116_vm5 }
 0x10c   :  { %v111_v53 = vmul.f32 %v1887_v50, %v110_v52  ;;  %v108_v54 = vsel %vm107_vm4, %v1885_v44, %v104_v51 }
 0x10d   :  { %v119_v57 = vmul.f32 %v108_v54, %v85_v13 }
 0x10e   :  { %v112_v55 = vmul.f32 0.5, %v111_v53 }
 0x10f   :  { %v124_v62 = vmul.f32 %v1868_v58, %v119_v57 }
 0x110   :  { %v113_v56 = vsub.f32 1.5, %v112_v55 }
 0x111   :  { %v129_v3 = vadd.f32 %v1869_v63, %v124_v62 }
 0x112   :  { %v114_v59 = vmul.f32 %v1887_v50, %v113_v56 }
 0x114   :  { %v118_v60 = vsel %vm117_vm7, %v1887_v50, %v114_v59 }
 0x115   :  { %v120_v61 = vmul.f32 %v118_v60, %v86_v18 }
 0x117   :  { %v125_v1 = vmul.f32 %v1868_v58, %v120_v61 }
 0x119   :  { %v130_v4 = vadd.f32 %v1869_v63, %v125_v1 }
 0x11b   :  { %v131_v5 = vpack.c.bf16 %v130_v4, %v129_v3 }
 0x11d   :  { %1600 = vmatmul.msk.bf16.vlgmr.msra.gmra.mxu0 %vm69_vm0, %v131_v5  ;;  %1601 = vmatmul.msk.bf16.vlgmr.msra.gmra.mxu1 %vm69_vm0, %v131_v5 }
 0x11e   :  { %1602 = vmatmul.msk.bf16.vlgmr.msra.gmra.mxu2 %vm69_vm0, %v131_v5 }
 0x19a   :  { %v184_v6 = vpop.f32.mrf.mxu0  ;;  %v198_v7 = vpop.f32.mrf.mxu1 }
 0x19b   :  { %v217_v8 = vpack.c.bf16 %v184_v6, %v184_v6  ;;  %v219_v9 = vpack.c.bf16 %v198_v7, %v198_v7 }
 0x19d   :  { %v340_v11 = vunpack.c.l.b16 %v217_v8  ;;  %v228_v12 = vsel %vm223_vm8, %v219_v9, 0  ;;  %v345_v13 = vunpack.c.l.b16 %v219_v9 }
 0x19e   :  { %237 = vmatpush.bf16.xpose.msra.mxu3 %v228_v12 }
 0x19f   :  { %v341_v14 = vpack.c.b16 %v340_v11, %v340_v11  ;;  %v346_v15 = vpack.c.b16 %v345_v13, %v345_v13 }
 0x1a1   :  { %v212_v16 = vpop.f32.mrf.mxu2  ;;  %347 = vrot.lane.b32.xlu2 %v346_v15, %s1996_s20  ;;  %342 = vrot.lane.b32.xlu0 %v341_v14, %s1996_s20 }
 0x1a2   :  { %v2136_v17 = vpack.c.bf16 %v212_v16, %v212_v16  ;;  %v186_v18 = vpop.f32.mrf.mxu0  ;;  %v200_v19 = vpop.f32.mrf.mxu1 }
 0x1a3   :  { %v218_v20 = vpack.c.bf16 %v186_v18, %v186_v18  ;;  %v220_v21 = vpack.c.bf16 %v200_v19, %v200_v19 }
 0x1a4   :  { %v296_v22 = vsel %vm294_vm9, %v2136_v17, 0 }
 0x1a5   :  { %v369_v23 = vunpack.c.l.b16 %v218_v20  ;;  %v374_v24 = vunpack.c.l.b16 %v220_v21  ;;  %305 = vmatpush.bf16.msrb.mxu1 %v296_v22  ;;  %1603 = vmatmul.msk.bf16.vlgmr.msra.gmra.mxu3 %vm223_vm8, %v217_v8  ;;  %v247_v25 = vsel %vm223_vm8, %v220_v21, 0 }
 0x1a6   :  { %256 = vmatpush.bf16.xpose.msrb.mxu0 %v247_v25 }
 0x1a7   :  { %v370_v26 = vpack.c.b16 %v369_v23, %v369_v23  ;;  %v375_v27 = vpack.c.b16 %v374_v24, %v374_v24 }
 0x1a9   :  { %v214_v28 = vpop.f32.mrf.mxu2  ;;  %376 = vrot.lane.b32.xlu2 %v375_v27, %s1996_s20  ;;  %371 = vrot.lane.b32.xlu1 %v370_v26, %s1996_s20 }
 0x1aa   :  { %v222_v29 = vpack.c.bf16 %v214_v28, %v214_v28 }
 0x1ac   :  { %v315_v30 = vsel %vm294_vm9, %v222_v29, 0  ;;  %v450_v8 = vunpack.c.l.b16 %v222_v29 }
 0x1ad   :  { %324 = vmatpush.bf16.msrb.mxu2 %v315_v30  ;;  %1604 = vmatmul.msk.bf16.vlgmr.msrb.gmra.mxu0 %vm223_vm8, %v218_v20  ;;  %v426_v30 = vunpack.c.l.b16 %v2136_v17  ;;  %v1829_v17 = vld [vmem:[%s2486_s4 + $0x10] sm:$0xff] }
 0x1ae   :  { %v451_v11 = vpack.c.b16 %v450_v8, %v450_v8 }
 0x1fb   :  { %v348_v31 = vpop.permute.xlu2 %347 }
 0x1fc   :  { %v353_v32 = vsel %vm223_vm8, %v348_v31, 0 }
 0x1fd   :  { %362 = vmatpush.bf16.xpose.msrb.mxu3 %v353_v32  ;;  %v427_v32 = vpack.c.b16 %v426_v30, %v426_v30 }
 0x203   :  { %v377_v33 = vpop.permute.xlu2 %376 }
 0x204   :  { %v382_v34 = vsel %vm223_vm8, %v377_v33, 0 }
 0x205   :  { %391 = vmatpush.bf16.xpose.msra.mxu0 %v382_v34 }
 0x213   :  { %v343_v35 = vpop.permute.xlu0 %342 }
 0x214   :  { %1607 = vmatmul.msk.bf16.vlgmr.msrb.gmra.mxu3 %vm223_vm8, %v343_v35 }
 0x21b   :  { %v372_v36 = vpop.permute.xlu1 %371 }
 0x21c   :  { %1608 = vmatmul.msk.bf16.vlgmr.msra.gmra.mxu0 %vm223_vm8, %v372_v36  ;;  %v1830_v36 = vld [vmem:[%s2486_s4 + $0x18] sm:$0xff] }
 0x21d   :  { %555 = vmatpush.bf16.msrb.mxu0 %v1830_v36 }
 0x221   :  { %556 = vmatpush.bf16.msrb.mxu0 %v1829_v17 }
 0x225   :  { %557 = vmatpush.bf16.msrb.mxu0 %v1828_v37 }
 0x228   :  { %v239_v40 = vpop.f32.mrf.mxu3 }
 0x229   :  { %v262_v43 = vmul.f32 0.125, %v239_v40  ;;  %558 = vmatpush.bf16.msrb.mxu0 %v1827_v39 }
 0x22a   :  { %v258_v44 = vpop.f32.mrf.mxu0 }
 0x22b   :  { %v263_v45 = vmul.f32 0.125, %v258_v44  ;;  %v264_v46 = vadd.f32 %v262_v43, %v2150_v42 }
 0x22d   :  { %v267_v47 = vsel %vm266_vm11, %v264_v46, -inf  ;;  %v265_v48 = vadd.f32 %v263_v45, %v2150_v42  ;;  %v1834_v45 = vld [vmem:[%s2486_s4 + $0x38] sm:$0xff] }
 0x22e   :  { %268 = vmax.xlane.f32.xlu0 %v267_v47  ;;  %514 = vmatpush.bf16.msra.mxu3 %v1834_v45  ;;  %v1871_v45 = vld [vmem:[%s2488_s6] ss:$0 sm:$0xff] }
 0x22f   :  { %v270_v49 = vsel %vm266_vm11, %v265_v48, -inf }
 0x230   :  { %v241_v50 = vpop.f32.mrf.mxu3  ;;  %271 = vmax.xlane.f32.xlu2 %v270_v49 }
 0x232   :  { %v260_v51 = vpop.f32.mrf.mxu0 }
 0x297   :  { %v364_v52 = vpop.f32.mrf.mxu3 }
 0x298   :  { %v397_v53 = vmul.f32 0.125, %v364_v52 }
 0x299   :  { %v393_v54 = vpop.f32.mrf.mxu0 }
 0x29a   :  { %v398_v55 = vmul.f32 0.125, %v393_v54  ;;  %v399_v56 = vadd.f32 %v397_v53, %v2150_v42 }
 0x29c   :  { %v401_v57 = vsel %vm266_vm11, %v399_v56, -inf  ;;  %v400_v58 = vadd.f32 %v398_v55, %v2150_v42 }
 0x29d   :  { %402 = vmax.xlane.f32.xlu2 %v401_v57  ;;  %v1832_v57 = vld [vmem:[%s2486_s4 + $0x28] sm:$0xff] }
 0x29e   :  { %v404_v59 = vsel %vm266_vm11, %v400_v58, -inf }
 0x29f   :  { %v366_v60 = vpop.f32.mrf.mxu3  ;;  %405 = vmax.xlane.f32.xlu1 %v404_v59 }
 0x2a1   :  { %v395_v61 = vpop.f32.mrf.mxu0  ;;  %v269_v62 = vpop.xlane.xlu0 %268 }
 0x2a2   :  { %v273_v3 = vsub.f32 %v264_v46, %v269_v62  ;;  %v1833_v46 = vld [vmem:[%s2486_s4 + $0x30] sm:$0xff] }
 0x2a3   :  { %v272_v63 = vpop.xlane.xlu2 %271  ;;  %515 = vmatpush.bf16.msra.mxu3 %v1833_v46 }
 0x2a4   :  { %v274_v1 = vsub.f32 %v265_v48, %v272_v63  ;;  %v275_v5 = vmul.f32 1.442695, %v273_v3 }
 0x2a6   :  { %v277_v4 = vmul.f32 1.442695, %v274_v1 }
 0x2a7   :  { %516 = vmatpush.bf16.msra.mxu3 %v1832_v57 }
 0x2a8   :  { %1888 = vpow2.f32 %v277_v4 }
 0x2a9   :  { %1890 = vpow2.f32 %v275_v5  ;;  %v1870_v5 = vld [vmem:[%s2487_s5] ss:$0 sm:$0xff] }
 0x2ae   :  { %v1889_v6 = vpop.eup %1888 }
 0x2af   :  { %v282_v7 = vsel %vm266_vm11, %v1889_v6, 0.0  ;;  %v1891_v9 = vpop.eup %1890 }
 0x2b0   :  { %283 = vadd.xlane.f32.xlu2 %v282_v7  ;;  %v279_v12 = vsel %vm266_vm11, %v1891_v9, 0.0 }
 0x2b8   :  { %280 = vadd.xlane.f32.xlu2 %v279_v12  ;;  %452 = vrot.lane.b32.xlu1 %v451_v11, %s1996_s20 }
 0x310   :  { %v403_v13 = vpop.xlane.xlu2 %402 }
 0x311   :  { %v407_v14 = vsub.f32 %v399_v56, %v403_v13 }
 0x312   :  { %v406_v15 = vpop.xlane.xlu1 %405 }
 0x313   :  { %v409_v16 = vmul.f32 1.442695, %v407_v14  ;;  %v408_v18 = vsub.f32 %v400_v58, %v406_v15  ;;  %v1831_v58 = vld [vmem:[%s2486_s4 + $0x20] sm:$0xff] }
 0x314   :  { %517 = vmatpush.bf16.msra.mxu3 %v1831_v58 }
 0x315   :  { %1892 = vpow2.f32 %v409_v16  ;;  %v411_v19 = vmul.f32 1.442695, %v408_v18 }
 0x317   :  { %1894 = vpow2.f32 %v411_v19 }
 0x31b   :  { %v1893_v20 = vpop.eup %1892 }
 0x31c   :  { %v413_v21 = vsel %vm266_vm11, %v1893_v20, 0.0 }
 0x31d   :  { %v1895_v22 = vpop.eup %1894  ;;  %414 = vadd.xlane.f32.xlu2 %v413_v21 }
 0x31e   :  { %v416_v23 = vsel %vm266_vm11, %v1895_v22, 0.0 }
 0x31f   :  { %417 = vadd.xlane.f32.xlu0 %v416_v23 }
 0x323   :  { %v284_v24 = vpop.xlane.xlu2 %283 }
 0x324   :  { %1896 = vrcp.f32 %v284_v24 }
 0x32a   :  { %v1897_v25 = vpop.eup %1896  ;;  %v453_v26 = vpop.permute.xlu1 %452 }
 0x32b   :  { %v288_v27 = vmul.f32 %v1897_v25, %v1889_v6  ;;  %v458_v28 = vsel %vm294_vm9, %v453_v26, 0  ;;  %v281_v29 = vpop.xlane.xlu2 %280  ;;  %v1836_v25 = vld [vmem:[%s2490_s8 + $0x8] sm:$0xff] }
 0x32c   :  { %1898 = vrcp.f32 %v281_v29  ;;  %467 = vmatpush.bf16.msra.mxu2 %v458_v28  ;;  %v1835_v29 = vld [vmem:[%s2490_s8] sm:$0xff] }
 0x32d   :  { %v290_v31 = vpack.c.bf16 %v288_v27, %v288_v27 }
 0x32f   :  { %1606 = vmatmul.msk.bf16.vlgmr.msrb.gmra.mxu2 %vm266_vm11, %v290_v31 }
 0x332   :  { %v1899_v33 = vpop.eup %1898 }
 0x333   :  { %v287_v34 = vmul.f32 %v1899_v33, %v1891_v9  ;;  %428 = vrot.lane.b32.xlu0 %v427_v32, %s1996_s20 }
 0x335   :  { %v289_v35 = vpack.c.bf16 %v287_v34, %v287_v34 }
 0x337   :  { %1605 = vmatmul.msk.bf16.vlgmr.msrb.gmra.mxu1 %vm266_vm11, %v289_v35 }
 0x390   :  { %v415_v40 = vpop.xlane.xlu2 %414 }
 0x392   :  { %v418_v38 = vpop.xlane.xlu0 %417 }
 0x393   :  { %1900 = vrcp.f32 %v418_v38 }
 0x394   :  { %1902 = vrcp.f32 %v415_v40 }
 0x399   :  { %v1901_v41 = vpop.eup %1900 }
 0x39a   :  { %v422_v43 = vmul.f32 %v1901_v41, %v1895_v22  ;;  %v1903_v47 = vpop.eup %1902 }
 0x39b   :  { %v421_v48 = vmul.f32 %v1903_v47, %v1893_v20 }
 0x39c   :  { %v424_v44 = vpack.c.bf16 %v422_v43, %v422_v43 }
 0x39d   :  { %v423_v51 = vpack.c.bf16 %v421_v48, %v421_v48 }
 0x39e   :  { %1610 = vmatmul.msk.bf16.vlgmr.msra.gmra.mxu2 %vm266_vm11, %v424_v44 }
 0x3a5   :  { %v429_v49 = vpop.permute.xlu0 %428 }
 0x3a6   :  { %v434_v50 = vsel %vm294_vm9, %v429_v49, 0  ;;  %v1872_v49 = vld [vmem:[%s2489_s7] ss:$0 sm:$0xff] }
 0x3a7   :  { %443 = vmatpush.bf16.msra.mxu1 %v434_v50 }
 0x3aa   :  { %1609 = vmatmul.msk.bf16.vlgmr.msra.gmra.mxu1 %vm266_vm11, %v423_v51 }
 0x3ab   :  { %659 = vmatpush.bf16.msrb.mxu1 %v1836_v25 }
 0x3af   :  { %660 = vmatpush.bf16.msrb.mxu1 %v1835_v29 }
 0x3b2   :  { %v326_v52 = vpop.f32.mrf.mxu2 }
 0x3b4   :  { %v307_v53 = vpop.f32.mrf.mxu1 }
 0x3b5   :  { %v330_v54 = vpack.c.bf16 %v326_v52, %v307_v53 }
 0x3b7   :  { %1652 = vmatmul.msk.bf16.vlgmr.msrb.gmra.mxu0 %vm223_vm8, %v330_v54 }
 0x3ba   :  { %v328_v55 = vpop.f32.mrf.mxu2 }
 0x3bc   :  { %v309_v56 = vpop.f32.mrf.mxu1 }
 0x3bd   :  { %v1873_v56 = vld [vmem:[%s2491_s9] ss:$0 sm:$0xff] }
 0x421   :  { %v469_v59 = vpop.f32.mrf.mxu2 }
 0x427   :  { %v445_v60 = vpop.f32.mrf.mxu1 }
 0x428   :  { %v473_v61 = vpack.c.bf16 %v469_v59, %v445_v60 }
 0x429   :  { %v471_v62 = vpop.f32.mrf.mxu2 }
 0x42a   :  { %1635 = vmatmul.msk.bf16.vlgmr.msra.gmra.mxu3 %vm223_vm8, %v473_v61 }
 0x42f   :  { %v447_v63 = vpop.f32.mrf.mxu1 }
 0x434   :  { %v560_v1 = vpop.f32.mrf.mxu0 }
 0x43c   :  { %v562_v9 = vpop.f32.mrf.mxu0 }
 0x4ad   :  { %v519_v3 = vpop.f32.mrf.mxu3 }
 0x4ae   :  { %v561_v4 = vadd.f32 %v560_v1, %v519_v3 }
 0x4b0   :  { %v565_v6 = vadd.f32 %v561_v4, %v2070_v0 }
 0x4b2   :  { %v2203_v7 = vadd.f32 %v1870_v5, %v565_v6 }
 0x4b4   :  { %v575_v8 = vsel %vm69_vm0, %v2203_v7, 0.0 }
 0x4b5   :  { %v521_v11 = vpop.f32.mrf.mxu3  ;;  %576 = vadd.xlane.f32.xlu2 %v575_v8 }
 0x4b6   :  { %v563_v12 = vadd.f32 %v562_v9, %v521_v11 }
 0x4b8   :  { %v566_v13 = vadd.f32 %v563_v12, %v2074_v2 }
 0x4ba   :  { %v2208_v14 = vadd.f32 %v1870_v5, %v566_v13 }
 0x4bc   :  { %v578_v15 = vsel %vm69_vm0, %v2208_v14, 0.0 }
 0x4bd   :  { %579 = vadd.xlane.f32.xlu2 %v578_v15 }
 0x528   :  { %v577_v16 = vpop.xlane.xlu2 %576 }
 0x529   :  { %v581_v0 = vmul.f32 %v577_v16, %v2078_v10  ;;  %v1840_v16 = vld [vmem:[%s2492_s10 + $0x18] sm:$0xff] }
 0x52a   :  { %799 = vmatpush.bf16.msrb.mxu2 %v1840_v16 }
 0x52b   :  { %v583_v18 = vsub.f32 %v2203_v7, %v581_v0 }
 0x52d   :  { %v585_v19 = vmul.f32 %v583_v18, %v583_v18 }
 0x52f   :  { %v587_v20 = vsel %vm69_vm0, %v585_v19, 0.0 }
 0x530   :  { %588 = vadd.xlane.f32.xlu2 %v587_v20  ;;  %v580_v21 = vpop.xlane.xlu2 %579 }
 0x531   :  { %v582_v22 = vmul.f32 %v580_v21, %v2078_v10 }
 0x533   :  { %v584_v2 = vsub.f32 %v2208_v14, %v582_v22 }
 0x535   :  { %v586_v23 = vmul.f32 %v584_v2, %v584_v2 }
 0x537   :  { %v590_v24 = vsel %vm69_vm0, %v586_v23, 0.0  ;;  %v1839_v23 = vld [vmem:[%s2492_s10 + $0x10] sm:$0xff] }
 0x538   :  { %591 = vadd.xlane.f32.xlu0 %v590_v24  ;;  %800 = vmatpush.bf16.msrb.mxu2 %v1839_v23 }
 0x5a3   :  { %v589_v26 = vpop.xlane.xlu2 %588 }
 0x5a4   :  { %v593_v27 = vmul.f32 %v589_v26, %v2078_v10 }
 0x5a6   :  { %v595_v28 = vadd.f32 1e-05, %v593_v27 }
 0x5a8   :  { %1904 = vrsqrt.f32 %v595_v28  ;;  %vm603_vm13 = vweird.f32 %v595_v28 }
 0x5ab   :  { %v592_v30 = vpop.xlane.xlu0 %591 }
 0x5ac   :  { %v594_v31 = vmul.f32 %v592_v30, %v2078_v10 }
 0x5ae   :  { %v1905_v32 = vpop.eup %1904  ;;  %v596_v33 = vadd.f32 1e-05, %v594_v31  ;;  %v1838_v31 = vld [vmem:[%s2492_s10 + $0x8] sm:$0xff] }
 0x5af   :  { %v598_v34 = vmul.f32 %v1905_v32, %v595_v28  ;;  %vm604_vm12 = vweird.f32 %v1905_v32  ;;  %801 = vmatpush.bf16.msrb.mxu2 %v1838_v31 }
 0x5b0   :  { %1906 = vrsqrt.f32 %v596_v33  ;;  %vm605_vm14 = vmor %vm603_vm13, %vm604_vm12  ;;  %vm613_vm1 = vweird.f32 %v596_v33 }
 0x5b1   :  { %v599_v35 = vmul.f32 %v1905_v32, %v598_v34 }
 0x5b3   :  { %v600_v36 = vmul.f32 0.5, %v599_v35 }
 0x5b5   :  { %v601_v17 = vsub.f32 1.5, %v600_v36 }
 0x5b6   :  { %v1907_v37 = vpop.eup %1906 }
 0x5b7   :  { %v602_v38 = vmul.f32 %v1905_v32, %v601_v17  ;;  %v608_v39 = vmul.f32 %v1907_v37, %v596_v33  ;;  %vm614_vm15 = vweird.f32 %v1907_v37  ;;  %v1837_v17 = vld [vmem:[%s2492_s10] sm:$0xff] }
 0x5b8   :  { %vm615_vm2 = vmor %vm613_vm1, %vm614_vm15  ;;  %802 = vmatpush.bf16.msrb.mxu2 %v1837_v17 }
 0x5b9   :  { %v609_v40 = vmul.f32 %v1907_v37, %v608_v39  ;;  %v606_v41 = vsel %vm605_vm14, %v1905_v32, %v602_v38 }
 0x5ba   :  { %v617_v46 = vmul.f32 %v606_v41, %v583_v18 }
 0x5bb   :  { %v610_v43 = vmul.f32 0.5, %v609_v40 }
 0x5bc   :  { %v622_v50 = vmul.f32 %v1871_v45, %v617_v46 }
 0x5bd   :  { %v611_v44 = vsub.f32 1.5, %v610_v43 }
 0x5be   :  { %v627_v53 = vadd.f32 %v1872_v49, %v622_v50 }
 0x5bf   :  { %v612_v47 = vmul.f32 %v1907_v37, %v611_v44 }
 0x5c1   :  { %v616_v48 = vsel %vm615_vm2, %v1907_v37, %v612_v47 }
 0x5c2   :  { %v618_v51 = vmul.f32 %v616_v48, %v584_v2 }
 0x5c4   :  { %v623_v52 = vmul.f32 %v1871_v45, %v618_v51 }
 0x5c6   :  { %v628_v54 = vadd.f32 %v1872_v49, %v623_v52 }
 0x5c8   :  { %v629_v55 = vpack.c.bf16 %v628_v54, %v627_v53 }
 0x5ca   :  { %1661 = vmatmul.msk.bf16.vlgmr.msrb.gmra.mxu1 %vm69_vm0, %v629_v55 }
 0x647   :  { %v662_v57 = vpop.f32.mrf.mxu1 }
 0x648   :  { %v2236_v58 = vadd.f32 %v1873_v56, %v662_v57 }
 0x64a   :  { %v2239_v59 = vmul.f32 0.70710677, %v2236_v58 }
 0x64c   :  { %v671_v60 = vmul.f32 %v2239_v59, %v2239_v59 }
 0x64e   :  { %v672_v61 = vmin.f32 %v671_v60, 16.0 }
 0x64f   :  { %v664_v62 = vpop.f32.mrf.mxu1 }
 0x650   :  { %v673_v63 = vmul.f32 2.1237322e-06, %v672_v61  ;;  %v684_v1 = vmul.f32 3.8918573e-05, %v672_v61  ;;  %v2243_v3 = vadd.f32 %v1873_v56, %v664_v62 }
 0x652   :  { %v674_v4 = vadd.f32 0.00028619796, %v673_v63  ;;  %v685_v5 = vadd.f32 0.001143296, %v684_v1  ;;  %v2246_v6 = vmul.f32 0.70710677, %v2243_v3 }
 0x654   :  { %v686_v8 = vmul.f32 %v685_v5, %v672_v61  ;;  %v711_v9 = vmul.f32 %v2246_v6, %v2246_v6  ;;  %v675_v11 = vmul.f32 %v674_v4, %v672_v61 }
 0x656   :  { %v687_v12 = vadd.f32 0.014752088, %v686_v8  ;;  %v712_v13 = vmin.f32 %v711_v9, 16.0  ;;  %v676_v19 = vadd.f32 0.0036580483, %v675_v11 }
 0x658   :  { %v688_v15 = vmul.f32 %v687_v12, %v672_v61  ;;  %v713_v0 = vmul.f32 2.1237322e-06, %v712_v13  ;;  %v724_v18 = vmul.f32 3.8918573e-05, %v712_v13  ;;  %v677_v26 = vmul.f32 %v676_v19, %v672_v61 }
 0x65a   :  { %v689_v20 = vadd.f32 0.112945676, %v688_v15  ;;  %v714_v21 = vadd.f32 0.00028619796, %v713_v0  ;;  %v725_v22 = vadd.f32 0.001143296, %v724_v18 }
 0x65b   :  { %v678_v33 = vadd.f32 0.05243302, %v677_v26 }
 0x65c   :  { %v690_v2 = vmul.f32 %v689_v20, %v672_v61  ;;  %v715_v24 = vmul.f32 %v714_v21, %v712_v13  ;;  %v726_v25 = vmul.f32 %v725_v22, %v712_v13  ;;  %v667_v22 = vmul.f32 0.5, %v2236_v58 }
 0x65d   :  { %v679_v38 = vmul.f32 %v678_v33, %v672_v61 }
 0x65e   :  { %v691_v27 = vadd.f32 0.4994258, %v690_v2  ;;  %v716_v28 = vadd.f32 0.0036580483, %v715_v24  ;;  %v727_v29 = vadd.f32 0.014752088, %v726_v25 }
 0x65f   :  { %v680_v44 = vadd.f32 0.18741608, %v679_v38  ;;  %v668_v2 = vmul.f32 0.5, %v2243_v3 }
 0x660   :  { %v692_v30 = vmul.f32 %v691_v27, %v672_v61  ;;  %v728_v32 = vmul.f32 %v727_v29, %v712_v13  ;;  %v717_v35 = vmul.f32 %v716_v28, %v712_v13 }
 0x661   :  { %v681_v49 = vmul.f32 %v680_v44, %v672_v61 }
 0x662   :  { %v693_v34 = vadd.f32 1.0, %v692_v30  ;;  %v729_v36 = vadd.f32 0.112945676, %v728_v32  ;;  %v718_v39 = vadd.f32 0.05243302, %v717_v35 }
 0x663   :  { %v682_v55 = vadd.f32 1.1283791, %v681_v49 }
 0x664   :  { %1908 = vrcp.f32 %v693_v34  ;;  %v730_v37 = vmul.f32 %v729_v36, %v712_v13  ;;  %v719_v46 = vmul.f32 %v718_v39, %v712_v13  ;;  %v705_v51 = vand.u32 2147483648, %v693_v34 }
 0x665   :  { %v703_v53 = vand.u32 2147483647, %v693_v34  ;;  %vm699_vm4 = vweird.f32 %v693_v34  ;;  %v683_v4 = vmul.f32 %v682_v55, %v2239_v59 }
 0x666   :  { %v731_v40 = vadd.f32 0.4994258, %v730_v37  ;;  %v720_v52 = vadd.f32 0.18741608, %v719_v46  ;;  %v706_v60 = vor.u32 1.1754944e-38, %v705_v51 }
 0x667   :  { %vm704_vm6 = vcmp.eq.f32.partialorder %v703_v53, 8.507059e+37  ;;  %v1713_v46 = vld [vmem:[%s2485_s3 + $0x50] sm:$0xf]  ;;  %v1842_v53 = vld [vmem:[%s2485_s3 + $0x38] sm:$0xf0] }
 0x668   :  { %v732_v41 = vmul.f32 %v731_v40, %v712_v13  ;;  %v721_v62 = vmul.f32 %v720_v52, %v712_v13  ;;  %v1705_v40 = vld [vmem:[%s2485_s3 + $0x48] sm:$0xf]  ;;  %v1693_v52 = vld [vmem:[%s2485_s3 + $0x30] sm:$0xf] }
 0x66a   :  { %v1909_v43 = vpop.eup %1908  ;;  %v733_v47 = vadd.f32 1.0, %v732_v41  ;;  %v722_v61 = vadd.f32 1.1283791, %v721_v62  ;;  %v1845_v41 = vld [vmem:[%s2485_s3 + $0x50] sm:$0xf0] }
 0x66b   :  { %v695_v45 = vmul.f32 %v1909_v43, %v693_v34  ;;  %vm700_vm3 = vweird.f32 %v1909_v43  ;;  %v1706_v44 = vor.u32 %v1845_v41, %v1705_v40 }
 0x66c   :  { %1910 = vrcp.f32 %v733_v47  ;;  %vm701_vm5 = vmor %vm699_vm4, %vm700_vm3  ;;  %v745_v8 = vand.u32 2147483648, %v733_v47  ;;  %v743_v12 = vand.u32 2147483647, %v733_v47  ;;  %vm739_vm10 = vweird.f32 %v733_v47 }
 0x66d   :  { %v696_v48 = vsub.f32 1.0, %v695_v45  ;;  %v723_v18 = vmul.f32 %v722_v61, %v2246_v6  ;;  %v1874_v6 = vld [vmem:[%s2493_s11] ss:$0 sm:$0xff]  ;;  %v1707_v45 = vld [vmem:[%s2485_s3 + $0x54] sm:$0xf0]  ;;  %920 = vmatpush.bf16.msrb.mxu3 %v1706_v44 }
 0x66e   :  { %v746_v16 = vor.u32 1.1754944e-38, %v745_v8  ;;  %vm744_vm13 = vcmp.eq.f32.partialorder %v743_v12, 8.507059e+37 }
 0x66f   :  { %v697_v50 = vmul.f32 %v1909_v43, %v696_v48 }
 0x671   :  { %v698_v54 = vadd.f32 %v1909_v43, %v697_v50 }
 0x672   :  { %v1911_v56 = vpop.eup %1910 }
 0x673   :  { %v702_v57 = vsel %vm701_vm5, %v1909_v43, %v698_v54  ;;  %v735_v63 = vmul.f32 %v1911_v56, %v733_v47  ;;  %vm740_vm7 = vweird.f32 %v1911_v56  ;;  %v1844_v43 = vld [vmem:[%s2485_s3 + $0x4c] sm:$0xf]  ;;  %v1846_v47 = vld [vmem:[%s2485_s3 + $0x58] sm:$0xf0]  ;;  %v1841_v54 = vld [vmem:[%s2485_s3 + $0x34] sm:$0xf] }
 0x674   :  { %v707_v1 = vsel %vm704_vm6, %v706_v60, %v702_v57  ;;  %vm741_vm12 = vmor %vm739_vm10, %vm740_vm7  ;;  %v1710_v49 = vor.u32 %v1844_v43, %v1707_v45  ;;  %v1714_v50 = vor.u32 %v1846_v47, %v1713_v46  ;;  %v1695_v57 = vld [vmem:[%s2485_s3 + $0x3c] sm:$0xf0]  ;;  %v1701_v60 = vld [vmem:[%s2485_s3 + $0x38] sm:$0xf] }
 0x675   :  { %v736_v5 = vsub.f32 1.0, %v735_v63  ;;  %v708_v9 = vmul.f32 %v707_v1, %v683_v4  ;;  %v1698_v62 = vor.u32 %v1841_v54, %v1695_v57  ;;  %v1843_v63 = vld [vmem:[%s2485_s3 + $0x40] sm:$0xf0] }
 0x676   :  { %934 = vmatpush.bf16.msra.mxu0 %v1710_v49  ;;  %948 = vmatpush.bf16.msra.mxu1 %v1714_v50  ;;  %v1702_v1 = vor.u32 %v1843_v63, %v1701_v60 }
 0x677   :  { %v737_v11 = vmul.f32 %v1911_v56, %v736_v5  ;;  %v1662_v0 = vclamps-f32 %v708_v9, 1.0 }
 0x679   :  { %v738_v15 = vadd.f32 %v1911_v56, %v737_v11  ;;  %v751_v21 = vadd.f32 1.0, %v1662_v0 }
 0x67a   :  { %935 = vmatpush.bf16.msra.mxu0 %v1698_v62  ;;  %949 = vmatpush.bf16.msra.mxu1 %v1702_v1 }
 0x67b   :  { %v742_v13 = vsel %vm741_vm12, %v1911_v56, %v738_v15  ;;  %v753_v24 = vmul.f32 %v751_v21, %v667_v22  ;;  %v1694_v56 = vor.u32 %v1842_v53, %v1693_v52 }
 0x67c   :  { %v747_v19 = vsel %vm744_vm13, %v746_v16, %v742_v13 }
 0x67d   :  { %v748_v20 = vmul.f32 %v747_v19, %v723_v18  ;;  %921 = vmatpush.bf16.msrb.mxu3 %v1694_v56 }
 0x67f   :  { %v1663_v59 = vclamps-f32 %v748_v20, 1.0 }
 0x681   :  { %v752_v23 = vadd.f32 1.0, %v1663_v59  ;;  %v1875_v59 = vld [vmem:[%s2483_s1 + $0x1] ss:$0 sm:$0xff] }
 0x683   :  { %v754_v25 = vmul.f32 %v752_v23, %v668_v2 }
 0x685   :  { %v755_v26 = vpack.c.bf16 %v754_v25, %v753_v24  ;;  %v1876_v24 = vld [vmem:[%s2484_s2 + $0x1] ss:$0 sm:$0xff] }
 0x687   :  { %1680 = vmatmul.msk.bf16.vlgmr.msrb.gmra.mxu2 %vm223_vm8, %v755_v26 }
 0x70a   :  { %v804_v27 = vpop.f32.mrf.mxu2 }
 0x70b   :  { %v805_v28 = vadd.f32 %v1874_v6, %v804_v27 }
 0x70d   :  { %v2271_v29 = vadd.f32 %v805_v28, %v2203_v7 }
 0x70f   :  { %v815_v58 = vsel %vm69_vm0, %v2271_v29, 0.0 }
 0x710   :  { %816 = vadd.xlane.f32.xlu1 %v815_v58 }
 0x712   :  { %v806_v3 = vpop.f32.mrf.mxu2 }
 0x713   :  { %v807_v30 = vadd.f32 %v1874_v6, %v806_v3 }
 0x715   :  { %v2276_v31 = vadd.f32 %v807_v30, %v2208_v14 }
 0x717   :  { %v818_v32 = vsel %vm69_vm0, %v2276_v31, 0.0 }
 0x718   :  { %819 = vadd.xlane.f32.xlu2 %v818_v32 }
 0x783   :  { %v817_v33 = vpop.xlane.xlu1 %816 }
 0x784   :  { %v821_v34 = vmul.f32 %v817_v33, %v2078_v10 }
 0x786   :  { %v823_v35 = vsub.f32 %v2271_v29, %v821_v34 }
 0x788   :  { %v825_v7 = vmul.f32 %v823_v35, %v823_v35 }
 0x78a   :  { %v827_v36 = vsel %vm69_vm0, %v825_v7, 0.0 }
 0x78b   :  { %v820_v17 = vpop.xlane.xlu2 %819  ;;  %828 = vadd.xlane.f32.xlu2 %v827_v36 }
 0x78c   :  { %v822_v37 = vmul.f32 %v820_v17, %v2078_v10 }
 0x78e   :  { %v824_v38 = vsub.f32 %v2276_v31, %v822_v37 }
 0x790   :  { %v826_v14 = vmul.f32 %v824_v38, %v824_v38 }
 0x792   :  { %v830_v39 = vsel %vm69_vm0, %v826_v14, 0.0 }
 0x793   :  { %831 = vadd.xlane.f32.xlu2 %v830_v39 }
 0x7fe   :  { %v829_v48 = vpop.xlane.xlu2 %828 }
 0x7ff   :  { %v833_v51 = vmul.f32 %v829_v48, %v2078_v10 }
 0x801   :  { %v835_v55 = vadd.f32 1e-05, %v833_v51 }
 0x803   :  { %1912 = vrsqrt.f32 %v835_v55  ;;  %vm843_vm15 = vweird.f32 %v835_v55 }
 0x806   :  { %v832_v4 = vpop.xlane.xlu2 %831 }
 0x807   :  { %v834_v5 = vmul.f32 %v832_v4, %v2078_v10 }
 0x809   :  { %v1913_v61 = vpop.eup %1912  ;;  %v836_v8 = vadd.f32 1e-05, %v834_v5 }
 0x80a   :  { %v838_v9 = vmul.f32 %v1913_v61, %v835_v55  ;;  %vm844_vm14 = vweird.f32 %v1913_v61 }
 0x80b   :  { %1914 = vrsqrt.f32 %v836_v8  ;;  %vm845_vm1 = vmor %vm843_vm15, %vm844_vm14  ;;  %vm853_vm3 = vweird.f32 %v836_v8 }
 0x80c   :  { %v839_v11 = vmul.f32 %v1913_v61, %v838_v9 }
 0x80e   :  { %v840_v12 = vmul.f32 0.5, %v839_v11 }
 0x810   :  { %v841_v15 = vsub.f32 1.5, %v840_v12 }
 0x811   :  { %v1915_v16 = vpop.eup %1914 }
 0x812   :  { %v842_v0 = vmul.f32 %v1913_v61, %v841_v15  ;;  %v848_v18 = vmul.f32 %v1915_v16, %v836_v8  ;;  %vm854_vm2 = vweird.f32 %v1915_v16 }
 0x813   :  { %vm855_vm4 = vmor %vm853_vm3, %vm854_vm2 }
 0x814   :  { %v849_v13 = vmul.f32 %v1915_v16, %v848_v18  ;;  %v846_v19 = vsel %vm845_vm1, %v1913_v61, %v842_v0 }
 0x815   :  { %v857_v22 = vmul.f32 %v846_v19, %v823_v35 }
 0x816   :  { %v850_v20 = vmul.f32 0.5, %v849_v13 }
 0x817   :  { %v862_v25 = vmul.f32 %v1875_v59, %v857_v22 }
 0x818   :  { %v851_v21 = vsub.f32 1.5, %v850_v20 }
 0x819   :  { %v867_v27 = vadd.f32 %v1876_v24, %v862_v25 }
 0x81a   :  { %v852_v2 = vmul.f32 %v1915_v16, %v851_v21 }
 0x81c   :  { %v856_v23 = vsel %vm855_vm4, %v1915_v16, %v852_v2 }
 0x81d   :  { %v858_v26 = vmul.f32 %v856_v23, %v824_v38 }
 0x81f   :  { %v863_v6 = vmul.f32 %v1875_v59, %v858_v26 }
 0x821   :  { %v868_v28 = vadd.f32 %v1876_v24, %v863_v6 }
 0x823   :  { %v869_v58 = vpack.c.bf16 %v868_v28, %v867_v27 }
 0x825   :  { %1715 = vmatmul.msk.bf16.vlgmr.msrb.gmra.mxu3 %vm69_vm0, %v869_v58  ;;  %1716 = vmatmul.msk.bf16.vlgmr.msra.gmra.mxu0 %vm69_vm0, %v869_v58 }
 0x826   :  { %1717 = vmatmul.msk.bf16.vlgmr.msra.gmra.mxu1 %vm69_vm0, %v869_v58 }
 0x8a2   :  { %v937_v3 = vpop.f32.mrf.mxu0 }
 0x8a3   :  { %v958_v30 = vpack.c.bf16 %v937_v3, %v937_v3  ;;  %v951_v32 = vpop.f32.mrf.mxu1 }
 0x8a4   :  { %v2333_v33 = vpack.c.bf16 %v951_v32, %v951_v32 }
 0x8a5   :  { %v966_v34 = vsel %vm223_vm8, %v958_v30, 0  ;;  %v1082_v35 = vunpack.c.l.b16 %v958_v30 }
 0x8a6   :  { %v1032_v7 = vsel %vm294_vm9, %v2333_v33, 0  ;;  %975 = vmatpush.bf16.xpose.msra.mxu2 %v966_v34  ;;  %v1163_v3 = vunpack.c.l.b16 %v2333_v33 }
 0x8a7   :  { %v1083_v36 = vpack.c.b16 %v1082_v35, %v1082_v35  ;;  %1041 = vmatpush.bf16.msrb.mxu0 %v1032_v7 }
 0x8a8   :  { %v923_v17 = vpop.f32.mrf.mxu3  ;;  %v1164_v30 = vpack.c.b16 %v1163_v3, %v1163_v3 }
 0x8a9   :  { %v956_v37 = vpack.c.bf16 %v923_v17, %v923_v17  ;;  %1084 = vrot.lane.b32.xlu2 %v1083_v36, %s1996_s20 }
 0x8aa   :  { %v939_v38 = vpop.f32.mrf.mxu0 }
 0x8ab   :  { %v1077_v14 = vunpack.c.l.b16 %v956_v37  ;;  %v959_v39 = vpack.c.bf16 %v939_v38, %v939_v38  ;;  %v953_v40 = vpop.f32.mrf.mxu1 }
 0x8ac   :  { %v2339_v41 = vpack.c.bf16 %v953_v40, %v953_v40 }
 0x8ad   :  { %v1078_v43 = vpack.c.b16 %v1077_v14, %v1077_v14  ;;  %v985_v44 = vsel %vm223_vm8, %v959_v39, 0  ;;  %v1111_v45 = vunpack.c.l.b16 %v959_v39  ;;  %1718 = vmatmul.msk.bf16.vlgmr.msra.gmra.mxu2 %vm223_vm8, %v956_v37 }
 0x8ae   :  { %v1051_v46 = vsel %vm294_vm9, %v2339_v41, 0  ;;  %994 = vmatpush.bf16.xpose.msra.mxu3 %v985_v44 }
 0x8af   :  { %v1112_v47 = vpack.c.b16 %v1111_v45, %v1111_v45  ;;  %1060 = vmatpush.bf16.msrb.mxu1 %v1051_v46  ;;  %1079 = vrot.lane.b32.xlu1 %v1078_v43, %s1996_s20  ;;  %v1187_v46 = vunpack.c.l.b16 %v2339_v41  ;;  %v1849_v41 = vld [vmem:[%s2486_s4 + $0x50] sm:$0xff] }
 0x8b0   :  { %v925_v48 = vpop.f32.mrf.mxu3 }
 0x8b1   :  { %v957_v49 = vpack.c.bf16 %v925_v48, %v925_v48  ;;  %1113 = vrot.lane.b32.xlu0 %v1112_v47, %s1996_s20 }
 0x8b3   :  { %v1106_v50 = vunpack.c.l.b16 %v957_v49 }
 0x8b5   :  { %v1107_v51 = vpack.c.b16 %v1106_v50, %v1106_v50  ;;  %1719 = vmatmul.msk.bf16.vlgmr.msra.gmra.mxu3 %vm223_vm8, %v957_v49  ;;  %v1188_v49 = vpack.c.b16 %v1187_v46, %v1187_v46 }
 0x8b7   :  { %1108 = vrot.lane.b32.xlu2 %v1107_v51, %s1996_s20 }
 0x903   :  { %v1085_v52 = vpop.permute.xlu2 %1084 }
 0x904   :  { %v1090_v53 = vsel %vm223_vm8, %v1085_v52, 0  ;;  %v1850_v52 = vld [vmem:[%s2486_s4 + $0x58] sm:$0xff] }
 0x905   :  { %1099 = vmatpush.bf16.xpose.msrb.mxu2 %v1090_v53  ;;  %v1848_v53 = vld [vmem:[%s2486_s4 + $0x48] sm:$0xff] }
 0x911   :  { %v1109_v57 = vpop.permute.xlu2 %1108 }
 0x921   :  { %v1080_v54 = vpop.permute.xlu1 %1079 }
 0x922   :  { %1730 = vmatmul.msk.bf16.vlgmr.msrb.gmra.mxu2 %vm223_vm8, %v1080_v54  ;;  %v1847_v54 = vld [vmem:[%s2486_s4 + $0x40] sm:$0xff] }
 0x923   :  { %v1114_v55 = vpop.permute.xlu0 %1113 }
 0x924   :  { %v1119_v56 = vsel %vm223_vm8, %v1114_v55, 0 }
 0x925   :  { %1128 = vmatpush.bf16.xpose.msrb.mxu3 %v1119_v56 }
 0x92c   :  { %1731 = vmatmul.msk.bf16.vlgmr.msrb.gmra.mxu3 %vm223_vm8, %v1109_v57 }
 0x92d   :  { %1292 = vmatpush.bf16.msra.mxu3 %v1850_v52 }
 0x930   :  { %v977_v60 = vpop.f32.mrf.mxu2 }
 0x931   :  { %v1000_v62 = vmul.f32 0.125, %v977_v60  ;;  %1293 = vmatpush.bf16.msra.mxu3 %v1849_v41 }
 0x933   :  { %v1002_v63 = vadd.f32 %v1000_v62, %v2150_v42 }
 0x935   :  { %v1004_v1 = vsel %vm266_vm11, %v1002_v63, -inf  ;;  %1294 = vmatpush.bf16.msra.mxu3 %v1848_v53 }
 0x936   :  { %1005 = vmax.xlane.f32.xlu0 %v1004_v1 }
 0x938   :  { %v979_v4 = vpop.f32.mrf.mxu2  ;;  %v996_v5 = vpop.f32.mrf.mxu3 }
 0x939   :  { %v1001_v61 = vmul.f32 0.125, %v996_v5  ;;  %1295 = vmatpush.bf16.msra.mxu3 %v1847_v54 }
 0x93b   :  { %v1003_v8 = vadd.f32 %v1001_v61, %v2150_v42 }
 0x93d   :  { %v1007_v9 = vsel %vm266_vm11, %v1003_v8, -inf }
 0x93e   :  { %1008 = vmax.xlane.f32.xlu2 %v1007_v9 }
 0x940   :  { %v998_v11 = vpop.f32.mrf.mxu3 }
 0x9a5   :  { %v1101_v12 = vpop.f32.mrf.mxu2 }
 0x9a6   :  { %v1134_v15 = vmul.f32 0.125, %v1101_v12 }
 0x9a8   :  { %v1136_v16 = vadd.f32 %v1134_v15, %v2150_v42 }
 0x9a9   :  { %v1006_v0 = vpop.xlane.xlu0 %1005 }
 0x9aa   :  { %v1010_v18 = vsub.f32 %v1002_v63, %v1006_v0  ;;  %v1138_v13 = vsel %vm266_vm11, %v1136_v16, -inf  ;;  %v1853_v0 = vld [vmem:[%s2486_s4 + $0x70] sm:$0xff] }
 0x9ab   :  { %1139 = vmax.xlane.f32.xlu1 %v1138_v13  ;;  %v1851_v13 = vld [vmem:[%s2486_s4 + $0x60] sm:$0xff] }
 0x9ac   :  { %v1012_v19 = vmul.f32 1.442695, %v1010_v18  ;;  %v1852_v18 = vld [vmem:[%s2486_s4 + $0x68] sm:$0xff] }
 0x9ad   :  { %v1103_v20 = vpop.f32.mrf.mxu2 }
 0x9ae   :  { %1916 = vpow2.f32 %v1012_v19 }
 0x9af   :  { %v1130_v21 = vpop.f32.mrf.mxu3 }
 0x9b0   :  { %v1135_v59 = vmul.f32 0.125, %v1130_v21 }
 0x9b1   :  { %v1009_v22 = vpop.xlane.xlu2 %1008 }
 0x9b2   :  { %v1011_v2 = vsub.f32 %v1003_v8, %v1009_v22  ;;  %v1137_v23 = vadd.f32 %v1135_v59, %v2150_v42 }
 0x9b4   :  { %v1917_v24 = vpop.eup %1916  ;;  %v1014_v25 = vmul.f32 1.442695, %v1011_v2  ;;  %v1141_v26 = vsel %vm266_vm11, %v1137_v23, -inf }
 0x9b5   :  { %1142 = vmax.xlane.f32.xlu0 %v1141_v26  ;;  %v1016_v6 = vsel %vm266_vm11, %v1917_v24, 0.0 }
 0x9b6   :  { %1918 = vpow2.f32 %v1014_v25  ;;  %1017 = vadd.xlane.f32.xlu2 %v1016_v6  ;;  %v1877_v25 = vld [vmem:[%s2487_s5 + $0x1] ss:$0 sm:$0xff] }
 0x9b7   :  { %v1132_v27 = vpop.f32.mrf.mxu3 }
 0x9bc   :  { %v1919_v28 = vpop.eup %1918 }
 0x9bd   :  { %v1019_v58 = vsel %vm266_vm11, %v1919_v28, 0.0 }
 0x9be   :  { %1020 = vadd.xlane.f32.xlu1 %v1019_v58 }
 0x9d7   :  { %1165 = vrot.lane.b32.xlu1 %v1164_v30, %s1996_s20 }
 0xa1e   :  { %v1140_v42 = vpop.xlane.xlu1 %1139 }
 0xa1f   :  { %v1144_v32 = vsub.f32 %v1136_v16, %v1140_v42  ;;  %v1854_v16 = vld [vmem:[%s2486_s4 + $0x78] sm:$0xff] }
 0xa20   :  { %1251 = vmatpush.bf16.msra.mxu2 %v1854_v16 }
 0xa21   :  { %v1146_v34 = vmul.f32 1.442695, %v1144_v32 }
 0xa23   :  { %1920 = vpow2.f32 %v1146_v34 }
 0xa24   :  { %1252 = vmatpush.bf16.msra.mxu2 %v1853_v0 }
 0xa28   :  { %v1143_v35 = vpop.xlane.xlu0 %1142  ;;  %1253 = vmatpush.bf16.msra.mxu2 %v1852_v18 }
 0xa29   :  { %v1921_v7 = vpop.eup %1920  ;;  %v1145_v36 = vsub.f32 %v1137_v23, %v1143_v35  ;;  %v1018_v17 = vpop.xlane.xlu2 %1017 }
 0xa2a   :  { %1922 = vrcp.f32 %v1018_v17  ;;  %v1150_v37 = vsel %vm266_vm11, %v1921_v7, 0.0 }
 0xa2b   :  { %v1148_v38 = vmul.f32 1.442695, %v1145_v36  ;;  %1151 = vadd.xlane.f32.xlu0 %v1150_v37 }
 0xa2c   :  { %1254 = vmatpush.bf16.msra.mxu2 %v1851_v13 }
 0xa2d   :  { %1924 = vpow2.f32 %v1148_v38 }
 0xa30   :  { %v1923_v14 = vpop.eup %1922 }
 0xa31   :  { %v1024_v39 = vmul.f32 %v1923_v14, %v1917_v24  ;;  %v1021_v33 = vpop.xlane.xlu1 %1020 }
 0xa32   :  { %1926 = vrcp.f32 %v1021_v33 }
 0xa33   :  { %v1925_v40 = vpop.eup %1924  ;;  %v1026_v43 = vpack.c.bf16 %v1024_v39, %v1024_v39  ;;  %v1856_v39 = vld [vmem:[%s2490_s8 + $0x18] sm:$0xff] }
 0xa34   :  { %v1153_v44 = vsel %vm266_vm11, %v1925_v40, 0.0 }
 0xa35   :  { %1720 = vmatmul.msk.bf16.vlgmr.msrb.gmra.mxu0 %vm266_vm11, %v1026_v43  ;;  %1154 = vadd.xlane.f32.xlu2 %v1153_v44  ;;  %v1855_v44 = vld [vmem:[%s2490_s8 + $0x10] sm:$0xff] }
 0xa38   :  { %v1927_v45 = vpop.eup %1926 }
 0xa39   :  { %v1025_v47 = vmul.f32 %v1927_v45, %v1919_v28 }
 0xa3b   :  { %v1027_v48 = vpack.c.bf16 %v1025_v47, %v1025_v47 }
 0xa3d   :  { %1721 = vmatmul.msk.bf16.vlgmr.msrb.gmra.mxu1 %vm266_vm11, %v1027_v48 }
 0xa3f   :  { %1189 = vrot.lane.b32.xlu0 %v1188_v49, %s1996_s20 }
 0xa49   :  { %v1166_v50 = vpop.permute.xlu1 %1165 }
 0xa4a   :  { %v1171_v51 = vsel %vm294_vm9, %v1166_v50, 0 }
 0xa4b   :  { %1180 = vmatpush.bf16.msra.mxu0 %v1171_v51 }
 0xa4f   :  { %1401 = vmatpush.bf16.msrb.mxu0 %v1856_v39 }
 0xa53   :  { %1402 = vmatpush.bf16.msrb.mxu0 %v1855_v44  ;;  %v1858_v44 = vld [vmem:[%s2492_s10 + $0x28] sm:$0xff] }
 0xa9e   :  { %v1152_v55 = vpop.xlane.xlu0 %1151 }
 0xa9f   :  { %1928 = vrcp.f32 %v1152_v55 }
 0xaa5   :  { %v1929_v56 = vpop.eup %1928 }
 0xaa6   :  { %v1158_v57 = vmul.f32 %v1929_v56, %v1921_v7 }
 0xaa8   :  { %v1160_v60 = vpack.c.bf16 %v1158_v57, %v1158_v57  ;;  %v1155_v62 = vpop.xlane.xlu2 %1154 }
 0xaa9   :  { %1930 = vrcp.f32 %v1155_v62 }
 0xaaa   :  { %1732 = vmatmul.msk.bf16.vlgmr.msra.gmra.mxu0 %vm266_vm11, %v1160_v60 }
 0xaaf   :  { %v1931_v63 = vpop.eup %1930 }
 0xab0   :  { %v1159_v1 = vmul.f32 %v1931_v63, %v1925_v40 }
 0xab1   :  { %v1190_v4 = vpop.permute.xlu0 %1189 }
 0xab2   :  { %v1195_v5 = vsel %vm294_vm9, %v1190_v4, 0  ;;  %v1043_v61 = vpop.f32.mrf.mxu0  ;;  %v1161_v8 = vpack.c.bf16 %v1159_v1, %v1159_v1  ;;  %v1879_v4 = vld [vmem:[%s2489_s7 + $0x1] ss:$0 sm:$0xff] }
 0xab3   :  { %1204 = vmatpush.bf16.msra.mxu1 %v1195_v5 }
 0xab6   :  { %1733 = vmatmul.msk.bf16.vlgmr.msra.gmra.mxu1 %vm266_vm11, %v1161_v8 }
 0xaba   :  { %v1045_v9 = vpop.f32.mrf.mxu0  ;;  %v1062_v11 = vpop.f32.mrf.mxu1 }
 0xabb   :  { %v1066_v12 = vpack.c.bf16 %v1062_v11, %v1043_v61 }
 0xabd   :  { %1775 = vmatmul.msk.bf16.vlgmr.msra.gmra.mxu3 %vm223_vm8, %v1066_v12 }
 0xac2   :  { %v1064_v15 = vpop.f32.mrf.mxu1 }
 0xac3   :  { %v1880_v15 = vld [vmem:[%s2491_s9 + $0x1] ss:$0 sm:$0xff] }
 0xb27   :  { %v1182_v19 = vpop.f32.mrf.mxu0 }
 0xb2f   :  { %v1184_v20 = vpop.f32.mrf.mxu0 }
 0xb33   :  { %v1206_v21 = vpop.f32.mrf.mxu1 }
 0xb34   :  { %v1210_v59 = vpack.c.bf16 %v1206_v21, %v1182_v19 }
 0xb36   :  { %1758 = vmatmul.msk.bf16.vlgmr.msra.gmra.mxu2 %vm223_vm8, %v1210_v59 }
 0xb3b   :  { %v1208_v22 = vpop.f32.mrf.mxu1 }
 0xb40   :  { %v1297_v2 = vpop.f32.mrf.mxu3 }
 0xb48   :  { %v1299_v28 = vpop.f32.mrf.mxu3 }
 0xbb9   :  { %v1256_v23 = vpop.f32.mrf.mxu2 }
 0xbba   :  { %v1298_v24 = vadd.f32 %v1297_v2, %v1256_v23 }
 0xbbc   :  { %v1302_v26 = vadd.f32 %v1298_v24, %v2271_v29 }
 0xbbe   :  { %v2405_v6 = vadd.f32 %v1877_v25, %v1302_v26 }
 0xbc0   :  { %v1315_v27 = vsel %vm69_vm0, %v2405_v6, 0.0 }
 0xbc1   :  { %v1258_v58 = vpop.f32.mrf.mxu2  ;;  %1316 = vadd.xlane.f32.xlu2 %v1315_v27 }
 0xbc2   :  { %v1300_v3 = vadd.f32 %v1299_v28, %v1258_v58 }
 0xbc4   :  { %v1303_v30 = vadd.f32 %v1300_v3, %v2276_v31 }
 0xbc6   :  { %v2410_v42 = vadd.f32 %v1877_v25, %v1303_v30  ;;  %v1860_v30 = vld [vmem:[%s2492_s10 + $0x38] sm:$0xff] }
 0xbc7   :  { %1543 = vmatpush.bf16.msrb.mxu1 %v1860_v30 }
 0xbc8   :  { %v1318_v32 = vsel %vm69_vm0, %v2410_v42, 0.0 }
 0xbc9   :  { %1319 = vadd.xlane.f32.xlu2 %v1318_v32 }
 0xc34   :  { %v1317_v34 = vpop.xlane.xlu2 %1316 }
 0xc35   :  { %v1321_v29 = vmul.f32 %v1317_v34, %v2078_v10 }
 0xc37   :  { %v1323_v35 = vsub.f32 %v2405_v6, %v1321_v29 }
 0xc39   :  { %v1325_v7 = vmul.f32 %v1323_v35, %v1323_v35 }
 0xc3b   :  { %v1327_v36 = vsel %vm69_vm0, %v1325_v7, 0.0 }
 0xc3c   :  { %1328 = vadd.xlane.f32.xlu2 %v1327_v36  ;;  %v1320_v17 = vpop.xlane.xlu2 %1319 }
 0xc3d   :  { %v1322_v37 = vmul.f32 %v1320_v17, %v2078_v10 }
 0xc3f   :  { %v1324_v31 = vsub.f32 %v2410_v42, %v1322_v37  ;;  %v1859_v37 = vld [vmem:[%s2492_s10 + $0x30] sm:$0xff] }
 0xc40   :  { %1544 = vmatpush.bf16.msrb.mxu1 %v1859_v37 }
 0xc41   :  { %v1326_v38 = vmul.f32 %v1324_v31, %v1324_v31 }
 0xc43   :  { %v1330_v14 = vsel %vm69_vm0, %v1326_v38, 0.0 }
 0xc44   :  { %1331 = vadd.xlane.f32.xlu0 %v1330_v14  ;;  %1545 = vmatpush.bf16.msrb.mxu1 %v1858_v44 }
 0xcaf   :  { %v1329_v33 = vpop.xlane.xlu2 %1328 }
 0xcb0   :  { %v1333_v40 = vmul.f32 %v1329_v33, %v2078_v10 }
 0xcb2   :  { %v1335_v43 = vadd.f32 1e-05, %v1333_v40 }
 0xcb4   :  { %1932 = vrsqrt.f32 %v1335_v43  ;;  %vm1343_vm11 = vweird.f32 %v1335_v43 }
 0xcb7   :  { %v1332_v45 = vpop.xlane.xlu0 %1331 }
 0xcb8   :  { %v1334_v46 = vmul.f32 %v1332_v45, %v2078_v10  ;;  %v1878_v10 = vld [vmem:[%s2488_s6 + $0x1] ss:$0 sm:$0xff] }
 0xcba   :  { %v1933_v47 = vpop.eup %1932  ;;  %v1336_v48 = vadd.f32 1e-05, %v1334_v46 }
 0xcbb   :  { %v1338_v49 = vmul.f32 %v1933_v47, %v1335_v43  ;;  %vm1344_vm9 = vweird.f32 %v1933_v47 }
 0xcbc   :  { %1934 = vrsqrt.f32 %v1336_v48  ;;  %vm1345_vm5 = vmor %vm1343_vm11, %vm1344_vm9  ;;  %vm1353_vm7 = vweird.f32 %v1336_v48 }
 0xcbd   :  { %v1339_v50 = vmul.f32 %v1933_v47, %v1338_v49 }
 0xcbf   :  { %v1340_v51 = vmul.f32 0.5, %v1339_v50  ;;  %v1857_v50 = vld [vmem:[%s2492_s10 + $0x20] sm:$0xff] }
 0xcc0   :  { %1546 = vmatpush.bf16.msrb.mxu1 %v1857_v50 }
 0xcc1   :  { %v1341_v52 = vsub.f32 1.5, %v1340_v51 }
 0xcc2   :  { %v1935_v41 = vpop.eup %1934 }
 0xcc3   :  { %v1342_v53 = vmul.f32 %v1933_v47, %v1341_v52  ;;  %v1348_v54 = vmul.f32 %v1935_v41, %v1336_v48  ;;  %vm1354_vm6 = vweird.f32 %v1935_v41 }
 0xcc4   :  { %vm1355_vm10 = vmor %vm1353_vm7, %vm1354_vm6 }
 0xcc5   :  { %v1349_v55 = vmul.f32 %v1935_v41, %v1348_v54  ;;  %v1346_v56 = vsel %vm1345_vm5, %v1933_v47, %v1342_v53 }
 0xcc6   :  { %v1357_v62 = vmul.f32 %v1346_v56, %v1323_v35 }
 0xcc7   :  { %v1350_v57 = vmul.f32 0.5, %v1349_v55 }
 0xcc8   :  { %v1362_v5 = vmul.f32 %v1878_v10, %v1357_v62 }
 0xcc9   :  { %v1351_v60 = vsub.f32 1.5, %v1350_v57 }
 0xcca   :  { %v1367_v9 = vadd.f32 %v1879_v4, %v1362_v5 }
 0xccb   :  { %v1352_v63 = vmul.f32 %v1935_v41, %v1351_v60 }
 0xccd   :  { %v1356_v1 = vsel %vm1355_vm10, %v1935_v41, %v1352_v63 }
 0xcce   :  { %v1358_v61 = vmul.f32 %v1356_v1, %v1324_v31 }
 0xcd0   :  { %v1363_v8 = vmul.f32 %v1878_v10, %v1358_v61 }
 0xcd2   :  { %v1368_v11 = vadd.f32 %v1879_v4, %v1363_v8 }
 0xcd4   :  { %v1369_v12 = vpack.c.bf16 %v1368_v11, %v1367_v9 }
 0xcd6   :  { %1792 = vmatmul.msk.bf16.vlgmr.msrb.gmra.mxu0 %vm69_vm0, %v1369_v12 }
 0xd53   :  { %v1404_v16 = vpop.f32.mrf.mxu0 }
 0xd54   :  { %v2438_v0 = vadd.f32 %v1880_v15, %v1404_v16 }
 0xd56   :  { %v2441_v18 = vmul.f32 0.70710677, %v2438_v0 }
 0xd58   :  { %v1413_v13 = vmul.f32 %v2441_v18, %v2441_v18 }
 0xd5a   :  { %v1414_v19 = vmin.f32 %v1413_v13, 16.0 }
 0xd5b   :  { %v1406_v20 = vpop.f32.mrf.mxu0 }
 0xd5c   :  { %v1415_v21 = vmul.f32 2.1237322e-06, %v1414_v19  ;;  %v1426_v59 = vmul.f32 3.8918573e-05, %v1414_v19  ;;  %v2445_v22 = vadd.f32 %v1880_v15, %v1406_v20 }
 0xd5e   :  { %v1416_v2 = vadd.f32 0.00028619796, %v1415_v21  ;;  %v1427_v23 = vadd.f32 0.001143296, %v1426_v59  ;;  %v2448_v24 = vmul.f32 0.70710677, %v2445_v22 }
 0xd60   :  { %v1428_v25 = vmul.f32 %v1427_v23, %v1414_v19  ;;  %v1453_v26 = vmul.f32 %v2448_v24, %v2448_v24  ;;  %v1417_v27 = vmul.f32 %v1416_v2, %v1414_v19 }
 0xd62   :  { %v1429_v28 = vadd.f32 0.014752088, %v1428_v25  ;;  %v1454_v58 = vmin.f32 %v1453_v26, 16.0  ;;  %v1418_v29 = vadd.f32 0.0036580483, %v1417_v27 }
 0xd64   :  { %v1430_v3 = vmul.f32 %v1429_v28, %v1414_v19  ;;  %v1455_v32 = vmul.f32 2.1237322e-06, %v1454_v58  ;;  %v1466_v34 = vmul.f32 3.8918573e-05, %v1454_v58  ;;  %v1419_v14 = vmul.f32 %v1418_v29, %v1414_v19 }
 0xd66   :  { %v1431_v35 = vadd.f32 0.112945676, %v1430_v3  ;;  %v1456_v7 = vadd.f32 0.00028619796, %v1455_v32  ;;  %v1467_v36 = vadd.f32 0.001143296, %v1466_v34 }
 0xd67   :  { %v1420_v46 = vadd.f32 0.05243302, %v1419_v14 }
 0xd68   :  { %v1432_v17 = vmul.f32 %v1431_v35, %v1414_v19  ;;  %v1457_v31 = vmul.f32 %v1456_v7, %v1454_v58  ;;  %v1468_v38 = vmul.f32 %v1467_v36, %v1454_v58  ;;  %v1409_v35 = vmul.f32 0.5, %v2438_v0 }
 0xd69   :  { %v1421_v52 = vmul.f32 %v1420_v46, %v1414_v19  ;;  %v1410_v7 = vmul.f32 0.5, %v2445_v22 }
 0xd6a   :  { %v1433_v39 = vadd.f32 0.4994258, %v1432_v17  ;;  %v1458_v33 = vadd.f32 0.0036580483, %v1457_v31  ;;  %v1469_v40 = vadd.f32 0.014752088, %v1468_v38 }
 0xd6b   :  { %v1422_v56 = vadd.f32 0.18741608, %v1421_v52 }
 0xd6c   :  { %v1434_v43 = vmul.f32 %v1433_v39, %v1414_v19  ;;  %v1470_v45 = vmul.f32 %v1469_v40, %v1454_v58  ;;  %v1459_v48 = vmul.f32 %v1458_v33, %v1454_v58 }
 0xd6d   :  { %v1423_v63 = vmul.f32 %v1422_v56, %v1414_v19 }
 0xd6e   :  { %v1435_v47 = vadd.f32 1.0, %v1434_v43  ;;  %v1471_v49 = vadd.f32 0.112945676, %v1470_v45  ;;  %v1460_v41 = vadd.f32 0.05243302, %v1459_v48 }
 0xd6f   :  { %v1424_v9 = vadd.f32 1.1283791, %v1423_v63 }
 0xd70   :  { %1936 = vrcp.f32 %v1435_v47  ;;  %v1472_v51 = vmul.f32 %v1471_v49, %v1454_v58  ;;  %v1461_v60 = vmul.f32 %v1460_v41, %v1454_v58  ;;  %v1447_v4 = vand.u32 2147483648, %v1435_v47 }
 0xd71   :  { %v1445_v61 = vand.u32 2147483647, %v1435_v47  ;;  %vm1441_vm13 = vweird.f32 %v1435_v47  ;;  %v1425_v21 = vmul.f32 %v1424_v9, %v2441_v18 }
 0xd72   :  { %v1473_v53 = vadd.f32 0.4994258, %v1472_v51  ;;  %v1462_v5 = vadd.f32 0.18741608, %v1461_v60  ;;  %v1448_v15 = vor.u32 1.1754944e-38, %v1447_v4 }
 0xd73   :  { %vm1446_vm15 = vcmp.eq.f32.partialorder %v1445_v61, 8.507059e+37 }
 0xd74   :  { %v1474_v54 = vmul.f32 %v1473_v53, %v1454_v58  ;;  %v1463_v16 = vmul.f32 %v1462_v5, %v1454_v58 }
 0xd76   :  { %v1937_v55 = vpop.eup %1936  ;;  %v1475_v10 = vadd.f32 1.0, %v1474_v54  ;;  %v1464_v19 = vadd.f32 1.1283791, %v1463_v16 }
 0xd77   :  { %v1437_v57 = vmul.f32 %v1937_v55, %v1435_v47  ;;  %vm1442_vm12 = vweird.f32 %v1937_v55 }
 0xd78   :  { %1938 = vrcp.f32 %v1475_v10  ;;  %vm1443_vm14 = vmor %vm1441_vm13, %vm1442_vm12  ;;  %v1487_v2 = vand.u32 2147483648, %v1475_v10  ;;  %v1485_v26 = vand.u32 2147483647, %v1475_v10  ;;  %vm1481_vm2 = vweird.f32 %v1475_v10 }
 0xd79   :  { %v1438_v62 = vsub.f32 1.0, %v1437_v57  ;;  %v1465_v30 = vmul.f32 %v1464_v19, %v2448_v24  ;;  %v1881_v24 = vld [vmem:[%s2493_s11 + $0x1] ss:$0 sm:$0xff] }
 0xd7a   :  { %v1488_v28 = vor.u32 1.1754944e-38, %v1487_v2  ;;  %vm1486_vm4 = vcmp.eq.f32.partialorder %v1485_v26, 8.507059e+37 }
 0xd7b   :  { %v1439_v1 = vmul.f32 %v1937_v55, %v1438_v62 }
 0xd7d   :  { %v1440_v8 = vadd.f32 %v1937_v55, %v1439_v1 }
 0xd7e   :  { %v1939_v11 = vpop.eup %1938 }
 0xd7f   :  { %v1444_v12 = vsel %vm1443_vm14, %v1937_v55, %v1440_v8  ;;  %v1477_v13 = vmul.f32 %v1939_v11, %v1475_v10  ;;  %vm1482_vm1 = vweird.f32 %v1939_v11 }
 0xd80   :  { %v1449_v20 = vsel %vm1446_vm15, %v1448_v15, %v1444_v12  ;;  %vm1483_vm3 = vmor %vm1481_vm2, %vm1482_vm1 }
 0xd81   :  { %v1478_v59 = vsub.f32 1.0, %v1477_v13  ;;  %v1450_v23 = vmul.f32 %v1449_v20, %v1425_v21 }
 0xd83   :  { %v1479_v25 = vmul.f32 %v1939_v11, %v1478_v59  ;;  %v1793_v3 = vclamps-f32 %v1450_v23, 1.0 }
 0xd85   :  { %v1480_v27 = vadd.f32 %v1939_v11, %v1479_v25  ;;  %v1493_v29 = vadd.f32 1.0, %v1793_v3 }
 0xd87   :  { %v1484_v58 = vsel %vm1483_vm3, %v1939_v11, %v1480_v27  ;;  %v1495_v17 = vmul.f32 %v1493_v29, %v1409_v35 }
 0xd88   :  { %v1489_v32 = vsel %vm1486_vm4, %v1488_v28, %v1484_v58 }
 0xd89   :  { %v1490_v34 = vmul.f32 %v1489_v32, %v1465_v30 }
 0xd8b   :  { %v1794_v18 = vclamps-f32 %v1490_v34, 1.0 }
 0xd8d   :  { %v1494_v36 = vadd.f32 1.0, %v1794_v18 }
 0xd8f   :  { %v1496_v37 = vmul.f32 %v1494_v36, %v1410_v7 }
 0xd91   :  { %v1497_v31 = vpack.c.bf16 %v1496_v37, %v1495_v17 }
 0xd93   :  { %1820 = vmatmul.msk.bf16.vlgmr.msrb.gmra.mxu1 %vm223_vm8, %v1497_v31 }
 0xe10   :  { %v1548_v38 = vpop.f32.mrf.mxu1 }
 0xe11   :  { %v1549_v14 = vadd.f32 %v1881_v24, %v1548_v38 }
 0xe13   :  { %v1553_v39 = vadd.f32 %v1549_v14, %v2405_v6 }
 0xe15   :  { %1555 = vst.msk [vmem:[#allocation5] sm:$0xff] %vm69_vm0, %v1553_v39 }
 0xe18   :  { %v1550_v33 = vpop.f32.mrf.mxu1 }
 0xe19   :  { %v1551_v0 = vadd.f32 %v1881_v24, %v1550_v33 }
 0xe1b   :  { %v1554_v22 = vadd.f32 %v1551_v0, %v2410_v42 }
 0xe1d   :  { %1556 = vst.msk [vmem:[#allocation5 + $0x8] sm:$0xff] %vm69_vm0, %v1554_v22 }
 0xe1e   :  { %1569 = dma.vmem_to_hbm [thread:$0]  %s1562_s14, 256, %s1564_s17, [#allocation4], %s1993_s26, %s1993_s26, %s1994_s27  }
 0xe1f   :  { %1990 = dma.done.wait [#allocation4], 256  }
 0xe20   :  { %1991 = vsyncadd [#allocation4], 4294967040 }
 0xe21   :  { %1574 = vsyncpa [#allocation3], 1 }
 0xe22   :  { %1575 = vsyncpa [#allocation4], 1 }

</bundles_post_ra>
